<compile_context>
chip_gen: v7x
topology: tpu7x:2x2x1
jax: 0.10.0
libtpu: 0.0.40
codegen_flags: <defaults>
</compile_context>

<pallas_src>
import functools

import jax
import jax.numpy as jnp
from jax.experimental import pallas as pl
from jax.experimental.pallas import tpu as pltpu


# ----------------------------------------------------------------------------
# Fused Pallas kernel: all TemporalBlocks + output Linear in one invocation
# ----------------------------------------------------------------------------
def _decoder_fused_kernel(*refs, K, dilations, downsample_flags):
    """refs = [x, (per layer: w1,b1,s1,sh1,w2,b2,s2,sh2[,wd,bd]), w_out,b_out, o]"""
    x_ref = refs[0]
    o_ref = refs[-1]
    params = list(refs[1:-1])

    h = x_ref[...].astype(jnp.float32)          # (Bb, T, Cin0)
    Bb, T, _ = h.shape

    def causal_gather(v, d):
        # v: (Bb, T, C) -> (Bb*T, K*C) of causally shifted taps.
        # Zero-pad once on the left; each tap is a static slice of the pad.
        C = v.shape[-1]
        pad = (K - 1) * d
        vp = jnp.concatenate(
            [jnp.zeros((Bb, pad, C), v.dtype), v], axis=1)          # (Bb, T+pad, C)
        taps = jnp.concatenate(
            [vp[:, k * d:k * d + T, :] for k in range(K)], axis=-1)  # (Bb, T, K*C)
        return taps.reshape(Bb * T, K * C)

    idx = 0
    for d, has_ds in zip(dilations, downsample_flags):
        w1, b1, s1, sh1, w2, b2, s2, sh2 = params[idx:idx + 8]
        idx += 8
        Cin = h.shape[-1]
        Ch = w1.shape[1]
        h2d = h.reshape(Bb * T, Cin)

        # residual path (1x1 conv == plain matmul when channel counts differ)
        if has_ds:
            wd, bd = params[idx:idx + 2]
            idx += 2
            res = (jnp.dot(h2d, wd[...].astype(jnp.float32),
                           preferred_element_type=jnp.float32)
                   + bd[...].astype(jnp.float32))
        else:
            res = h2d

        # conv1 (single MXU matmul over K*Cin) -> ReLU -> BN1 (-> dropout=id)
        y = (jnp.dot(causal_gather(h, d), w1[...].astype(jnp.float32),
                     preferred_element_type=jnp.float32)
             + b1[...].astype(jnp.float32))
        y = (jnp.maximum(y, 0.0) * s1[...].astype(jnp.float32)
             + sh1[...].astype(jnp.float32))

        # conv2 -> ReLU -> BN2 (-> dropout=id)
        y = (jnp.dot(causal_gather(y.reshape(Bb, T, Ch), d),
                     w2[...].astype(jnp.float32),
                     preferred_element_type=jnp.float32)
             + b2[...].astype(jnp.float32))
        y = (jnp.maximum(y, 0.0) * s2[...].astype(jnp.float32)
             + sh2[...].astype(jnp.float32))

        h = jnp.maximum(y + res, 0.0).reshape(Bb, T, Ch)

    # final Linear, stored lane-dense (Dout padded to a multiple of 128)
    w_out, b_out = params[idx], params[idx + 1]
    Ch = h.shape[-1]
    out = (jnp.dot(h.reshape(Bb * T, Ch), w_out[...].astype(jnp.float32),
                   preferred_element_type=jnp.float32)
           + b_out[...].astype(jnp.float32))
    o_ref[...] = out.reshape(Bb, T, -1).astype(o_ref.dtype)


# ----------------------------------------------------------------------------
# Wrapper
# ----------------------------------------------------------------------------
def _pick_block_b(B, T, K, c_max, budget_bytes=8 << 20):
    """Largest divisor of B whose per-step activation footprint fits budget."""
    # Rough per-batch-row footprint: padded buffer + gathered taps + two
    # activation copies, all f32, at the widest layer.
    bytes_per_b = 4 * T * (K * c_max * 2 + 3 * c_max)
    for cand in range(B, 0, -1):
        if B % cand == 0 and cand * bytes_per_b <= budget_bytes:
            return cand
    return 1


def decoder_forward(x, layer_params, dilations, w_out, b_out, *, block_b=None):
    B, T, E = x.shape
    Ch, Dout = w_out.shape
    dpad = ((Dout + 127) // 128) * 128            # lane-dense output width

    K = layer_params[0]["w1"].shape[0]
    c_max = max(max(p["w1"].shape[1], p["w1"].shape[2]) for p in layer_params)
    c_max = max(c_max, E, Ch, dpad)

    if block_b is None:
        block_b = _pick_block_b(B, T, K, c_max)
    assert B % block_b == 0
    grid = (B // block_b,)

    downsample_flags = tuple("wd" in p for p in layer_params)

    def mat_spec(r, c):
        return pl.BlockSpec((r, c), lambda b: (0, 0))   # resident across grid

    def vec_spec(n):
        return pl.BlockSpec((1, n), lambda b: (0, 0))   # resident across grid

    in_specs = [pl.BlockSpec((block_b, T, E), lambda b: (b, 0, 0))]
    args = [x]

    flops = 0
    bytes_accessed = int(x.size) * 4
    for p in layer_params:
        k, cin, ch = p["w1"].shape
        w1r = p["w1"].reshape(k * cin, ch)        # (K*Cin, Ch)
        w2r = p["w2"].reshape(k * ch, ch)         # (K*Ch, Ch)
        in_specs += [mat_spec(k * cin, ch), vec_spec(ch), vec_spec(ch),
                     vec_spec(ch),
                     mat_spec(k * ch, ch), vec_spec(ch), vec_spec(ch),
                     vec_spec(ch)]
        args += [w1r, p["b1"], p["bn1_scale"], p["bn1_shift"],
                 w2r, p["b2"], p["bn2_scale"], p["bn2_shift"]]
        flops += 2 * B * T * (k * cin * ch + k * ch * ch)
        bytes_accessed += int(w1r.size + w2r.size + 8 * ch) * 4
        if "wd" in p:
            in_specs += [mat_spec(cin, ch), vec_spec(ch)]
            args += [p["wd"], p["bd"]]
            flops += 2 * B * T * cin * ch
            bytes_accessed += int(p["wd"].size + p["bd"].size) * 4

    w_out_p = jnp.pad(w_out, ((0, 0), (0, dpad - Dout)))
    b_out_p = jnp.pad(b_out, ((0, 0), (0, dpad - Dout)))
    in_specs += [mat_spec(Ch, dpad), vec_spec(dpad)]
    args += [w_out_p, b_out_p]
    flops += 2 * B * T * Ch * dpad
    bytes_accessed += int(w_out_p.size + b_out_p.size + B * T * dpad) * 4

    kernel = functools.partial(_decoder_fused_kernel, K=K,
                               dilations=tuple(dilations),
                               downsample_flags=downsample_flags)

    out = pl.pallas_call(
        kernel,
        out_shape=jax.ShapeDtypeStruct((B, T, dpad), x.dtype),
        grid=grid,
        in_specs=in_specs,
        out_specs=pl.BlockSpec((block_b, T, dpad), lambda b: (b, 0, 0)),
        compiler_params=pltpu.CompilerParams(
            dimension_semantics=("parallel",)),
        cost_estimate=pl.CostEstimate(flops=flops, transcendentals=0,
                                      bytes_accessed=bytes_accessed),
    )(*args)
    return out[..., :Dout]


# ----------------------------------------------------------------------------
# Parameter init (deterministic, synthetic) + pure-JAX reference
# ----------------------------------------------------------------------------
def init_decoder_params(key, embedding_dim, output_dim, hidden_dim,
                        num_layers, kernel_size, eps=1e-5):
    bn_scale = jnp.full((1, hidden_dim), 1.0 / jnp.sqrt(1.0 + eps),
                        jnp.float32)  # gamma=1, running_var=1 (eval defaults)
    bn_shift = jnp.zeros((1, hidden_dim), jnp.float32)  # beta=0, running_mean=0

    layer_params, dilations = [], []
    for i in range(num_layers):
        cin = embedding_dim if i == 0 else hidden_dim
        key, k1, k2, k3, k4, k5, k6 = jax.random.split(key, 7)
        p = {
            "w1": 0.01 * jax.random.normal(k1, (kernel_size, cin, hidden_dim),
                                           jnp.float32),
            "b1": 0.01 * jax.random.normal(k2, (1, hidden_dim), jnp.float32),
            "w2": 0.01 * jax.random.normal(k3, (kernel_size, hidden_dim,
                                                hidden_dim), jnp.float32),
            "b2": 0.01 * jax.random.normal(k4, (1, hidden_dim), jnp.float32),
            "bn1_scale": bn_scale, "bn1_shift": bn_shift,
            "bn2_scale": bn_scale, "bn2_shift": bn_shift,
        }
        if cin != hidden_dim:
            p["wd"] = 0.01 * jax.random.normal(k5, (cin, hidden_dim),
                                               jnp.float32)
            p["bd"] = 0.01 * jax.random.normal(k6, (1, hidden_dim),
                                               jnp.float32)
        layer_params.append(p)
        dilations.append(2 ** i)

    key, k1, k2 = jax.random.split(key, 3)
    w_out = (jax.random.normal(k1, (hidden_dim, output_dim), jnp.float32)
             / jnp.sqrt(hidden_dim))
    b_out = 0.01 * jax.random.normal(k2, (1, output_dim), jnp.float32)
    return layer_params, dilations, w_out, b_out


def _causal_conv_ref(x, w, b, dilation):
    # x: (B, T, Cin), w: (K, Cin, Cout) — left-pad only == pad+chop in PyTorch
    pad = (w.shape[0] - 1) * dilation
    y = jax.lax.conv_general_dilated(
        x, w, window_strides=(1,), padding=[(pad, 0)],
        rhs_dilation=(dilation,), dimension_numbers=("NWC", "WIO", "NWC"))
    return y + b


def decoder_reference(x, layer_params, dilations, w_out, b_out):
    h = x
    for p, d in zip(layer_params, dilations):
        if "wd" in p:
            res = jnp.einsum("btc,cd->btd", h, p["wd"]) + p["bd"]
        else:
            res = h
        y = _causal_conv_ref(h, p["w1"], p["b1"], d)
        y = jax.nn.relu(y) * p["bn1_scale"] + p["bn1_shift"]
        y = _causal_conv_ref(y, p["w2"], p["b2"], d)
        y = jax.nn.relu(y) * p["bn2_scale"] + p["bn2_shift"]
        h = jax.nn.relu(y + res)
    return jnp.einsum("btc,cd->btd", h, w_out) + b_out


# ----------------------------------------------------------------------------
if __name__ == "__main__":
    B, T = 2, 16
    embedding_dim, hidden_dim, output_dim = 8, 32, 8
    num_layers, kernel_size = 4, 5

    key = jax.random.PRNGKey(0)
    key, kx = jax.random.split(key)
    x = jax.random.normal(kx, (B, T, embedding_dim), jnp.float32)

    layer_params, dilations, w_out, b_out = init_decoder_params(
        key, embedding_dim, output_dim, hidden_dim, num_layers, kernel_size)

    out = decoder_forward(x, layer_params, dilations, w_out, b_out)
    out = jax.block_until_ready(out)

    ref = decoder_reference(x, layer_params, dilations, w_out, b_out)
    ref = jax.block_until_ready(ref)

    assert out.shape == (B, T, output_dim), out.shape
    assert jnp.allclose(out, ref, atol=1e-5, rtol=1e-5), (
        float(jnp.max(jnp.abs(out - ref))))
    print("KERNEL_OK")
</pallas_src>

<mosaic_0001>
module attributes {stable_mosaic.version = 11 : i64} {
  func.func @_decoder_fused_kernel(%arg0: i32, %arg1: memref<2x16x8xf32, #tpu.memory_space<vmem>>, %arg2: memref<40x32xf32, #tpu.memory_space<vmem>>, %arg3: memref<1x32xf32, #tpu.memory_space<vmem>>, %arg4: memref<1x32xf32, #tpu.memory_space<vmem>>, %arg5: memref<1x32xf32, #tpu.memory_space<vmem>>, %arg6: memref<160x32xf32, #tpu.memory_space<vmem>>, %arg7: memref<1x32xf32, #tpu.memory_space<vmem>>, %arg8: memref<1x32xf32, #tpu.memory_space<vmem>>, %arg9: memref<1x32xf32, #tpu.memory_space<vmem>>, %arg10: memref<8x32xf32, #tpu.memory_space<vmem>>, %arg11: memref<1x32xf32, #tpu.memory_space<vmem>>, %arg12: memref<160x32xf32, #tpu.memory_space<vmem>>, %arg13: memref<1x32xf32, #tpu.memory_space<vmem>>, %arg14: memref<1x32xf32, #tpu.memory_space<vmem>>, %arg15: memref<1x32xf32, #tpu.memory_space<vmem>>, %arg16: memref<160x32xf32, #tpu.memory_space<vmem>>, %arg17: memref<1x32xf32, #tpu.memory_space<vmem>>, %arg18: memref<1x32xf32, #tpu.memory_space<vmem>>, %arg19: memref<1x32xf32, #tpu.memory_space<vmem>>, %arg20: memref<160x32xf32, #tpu.memory_space<vmem>>, %arg21: memref<1x32xf32, #tpu.memory_space<vmem>>, %arg22: memref<1x32xf32, #tpu.memory_space<vmem>>, %arg23: memref<1x32xf32, #tpu.memory_space<vmem>>, %arg24: memref<160x32xf32, #tpu.memory_space<vmem>>, %arg25: memref<1x32xf32, #tpu.memory_space<vmem>>, %arg26: memref<1x32xf32, #tpu.memory_space<vmem>>, %arg27: memref<1x32xf32, #tpu.memory_space<vmem>>, %arg28: memref<160x32xf32, #tpu.memory_space<vmem>>, %arg29: memref<1x32xf32, #tpu.memory_space<vmem>>, %arg30: memref<1x32xf32, #tpu.memory_space<vmem>>, %arg31: memref<1x32xf32, #tpu.memory_space<vmem>>, %arg32: memref<160x32xf32, #tpu.memory_space<vmem>>, %arg33: memref<1x32xf32, #tpu.memory_space<vmem>>, %arg34: memref<1x32xf32, #tpu.memory_space<vmem>>, %arg35: memref<1x32xf32, #tpu.memory_space<vmem>>, %arg36: memref<32x128xf32, #tpu.memory_space<vmem>>, %arg37: memref<1x128xf32, #tpu.memory_space<vmem>>, %arg38: memref<2x16x128xf32, #tpu.memory_space<vmem>>) attributes {dimension_semantics = [#tpu.dimension_semantics<parallel>], iteration_bounds = array<i64: 1>, scalar_prefetch = 0 : i64, scratch_operands = 0 : i64, tpu.core_type = #tpu.core_type<tc>, window_params = [{transform_indices = @transform_0, window_bounds = array<i64: 2, 16, 8>}, {pipeline_mode = #tpu.pipeline_mode<synchronous>, transform_indices = @transform_1, window_bounds = array<i64: 40, 32>}, {pipeline_mode = #tpu.pipeline_mode<synchronous>, transform_indices = @transform_2, window_bounds = array<i64: 1, 32>}, {pipeline_mode = #tpu.pipeline_mode<synchronous>, transform_indices = @transform_3, window_bounds = array<i64: 1, 32>}, {pipeline_mode = #tpu.pipeline_mode<synchronous>, transform_indices = @transform_4, window_bounds = array<i64: 1, 32>}, {pipeline_mode = #tpu.pipeline_mode<synchronous>, transform_indices = @transform_5, window_bounds = array<i64: 160, 32>}, {pipeline_mode = #tpu.pipeline_mode<synchronous>, transform_indices = @transform_6, window_bounds = array<i64: 1, 32>}, {pipeline_mode = #tpu.pipeline_mode<synchronous>, transform_indices = @transform_7, window_bounds = array<i64: 1, 32>}, {pipeline_mode = #tpu.pipeline_mode<synchronous>, transform_indices = @transform_8, window_bounds = array<i64: 1, 32>}, {pipeline_mode = #tpu.pipeline_mode<synchronous>, transform_indices = @transform_9, window_bounds = array<i64: 8, 32>}, {pipeline_mode = #tpu.pipeline_mode<synchronous>, transform_indices = @transform_10, window_bounds = array<i64: 1, 32>}, {pipeline_mode = #tpu.pipeline_mode<synchronous>, transform_indices = @transform_11, window_bounds = array<i64: 160, 32>}, {pipeline_mode = #tpu.pipeline_mode<synchronous>, transform_indices = @transform_12, window_bounds = array<i64: 1, 32>}, {pipeline_mode = #tpu.pipeline_mode<synchronous>, transform_indices = @transform_13, window_bounds = array<i64: 1, 32>}, {pipeline_mode = #tpu.pipeline_mode<synchronous>, transform_indices = @transform_14, window_bounds = array<i64: 1, 32>}, {pipeline_mode = #tpu.pipeline_mode<synchronous>, transform_indices = @transform_15, window_bounds = array<i64: 160, 32>}, {pipeline_mode = #tpu.pipeline_mode<synchronous>, transform_indices = @transform_16, window_bounds = array<i64: 1, 32>}, {pipeline_mode = #tpu.pipeline_mode<synchronous>, transform_indices = @transform_17, window_bounds = array<i64: 1, 32>}, {pipeline_mode = #tpu.pipeline_mode<synchronous>, transform_indices = @transform_18, window_bounds = array<i64: 1, 32>}, {pipeline_mode = #tpu.pipeline_mode<synchronous>, transform_indices = @transform_19, window_bounds = array<i64: 160, 32>}, {pipeline_mode = #tpu.pipeline_mode<synchronous>, transform_indices = @transform_20, window_bounds = array<i64: 1, 32>}, {pipeline_mode = #tpu.pipeline_mode<synchronous>, transform_indices = @transform_21, window_bounds = array<i64: 1, 32>}, {pipeline_mode = #tpu.pipeline_mode<synchronous>, transform_indices = @transform_22, window_bounds = array<i64: 1, 32>}, {pipeline_mode = #tpu.pipeline_mode<synchronous>, transform_indices = @transform_23, window_bounds = array<i64: 160, 32>}, {pipeline_mode = #tpu.pipeline_mode<synchronous>, transform_indices = @transform_24, window_bounds = array<i64: 1, 32>}, {pipeline_mode = #tpu.pipeline_mode<synchronous>, transform_indices = @transform_25, window_bounds = array<i64: 1, 32>}, {pipeline_mode = #tpu.pipeline_mode<synchronous>, transform_indices = @transform_26, window_bounds = array<i64: 1, 32>}, {pipeline_mode = #tpu.pipeline_mode<synchronous>, transform_indices = @transform_27, window_bounds = array<i64: 160, 32>}, {pipeline_mode = #tpu.pipeline_mode<synchronous>, transform_indices = @transform_28, window_bounds = array<i64: 1, 32>}, {pipeline_mode = #tpu.pipeline_mode<synchronous>, transform_indices = @transform_29, window_bounds = array<i64: 1, 32>}, {pipeline_mode = #tpu.pipeline_mode<synchronous>, transform_indices = @transform_30, window_bounds = array<i64: 1, 32>}, {pipeline_mode = #tpu.pipeline_mode<synchronous>, transform_indices = @transform_31, window_bounds = array<i64: 160, 32>}, {pipeline_mode = #tpu.pipeline_mode<synchronous>, transform_indices = @transform_32, window_bounds = array<i64: 1, 32>}, {pipeline_mode = #tpu.pipeline_mode<synchronous>, transform_indices = @transform_33, window_bounds = array<i64: 1, 32>}, {pipeline_mode = #tpu.pipeline_mode<synchronous>, transform_indices = @transform_34, window_bounds = array<i64: 1, 32>}, {pipeline_mode = #tpu.pipeline_mode<synchronous>, transform_indices = @transform_35, window_bounds = array<i64: 32, 128>}, {pipeline_mode = #tpu.pipeline_mode<synchronous>, transform_indices = @transform_36, window_bounds = array<i64: 1, 128>}, {transform_indices = @transform_37, window_bounds = array<i64: 2, 16, 128>}]} {
    %c0 = arith.constant 0 : index
    %c0_0 = arith.constant 0 : index
    %c0_1 = arith.constant 0 : index
    %0 = vector.load %arg1[%c0, %c0_0, %c0_1] : memref<2x16x8xf32, #tpu.memory_space<vmem>>, vector<2x16x8xf32>
    %1 = vector.shape_cast %0 : vector<2x16x8xf32> to vector<32x8xf32>
    %c0_2 = arith.constant 0 : index
    %c0_3 = arith.constant 0 : index
    %2 = vector.load %arg10[%c0_2, %c0_3] : memref<8x32xf32, #tpu.memory_space<vmem>>, vector<8x32xf32>
    %cst = arith.constant dense<0.000000e+00> : vector<32x32xf32>
    %3 = tpu.matmul %1, %2, %cst {dimension_numbers = #tpu.dot_dimension_numbers<[1], [0], [0], [1], [0, 0, 1, 1], [], []>} : vector<32x8xf32>, vector<8x32xf32>, vector<32x32xf32> -> vector<32x32xf32>
    %c0_4 = arith.constant 0 : index
    %c0_5 = arith.constant 0 : index
    %4 = vector.load %arg11[%c0_4, %c0_5] : memref<1x32xf32, #tpu.memory_space<vmem>>, vector<1x32xf32>
    %5 = vector.broadcast %4 : vector<1x32xf32> to vector<32x32xf32>
    %6 = arith.addf %3, %5 : vector<32x32xf32>
    %cst_6 = arith.constant 0.000000e+00 : f32
    %7 = vector.broadcast %cst_6 : f32 to vector<2x4x8xf32>
    %8 = tpu.concatenate %7, %0 in 1 : vector<2x4x8xf32>, vector<2x16x8xf32> -> vector<2x20x8xf32>
    %9 = vector.extract_strided_slice %8 {offsets = [0, 0, 0], sizes = [2, 16, 8], strides = [1, 1, 1]} : vector<2x20x8xf32> to vector<2x16x8xf32>
    %10 = vector.extract_strided_slice %8 {offsets = [0, 1, 0], sizes = [2, 16, 8], strides = [1, 1, 1]} : vector<2x20x8xf32> to vector<2x16x8xf32>
    %11 = vector.extract_strided_slice %8 {offsets = [0, 2, 0], sizes = [2, 16, 8], strides = [1, 1, 1]} : vector<2x20x8xf32> to vector<2x16x8xf32>
    %12 = vector.extract_strided_slice %8 {offsets = [0, 3, 0], sizes = [2, 16, 8], strides = [1, 1, 1]} : vector<2x20x8xf32> to vector<2x16x8xf32>
    %13 = vector.extract_strided_slice %8 {offsets = [0, 4, 0], sizes = [2, 16, 8], strides = [1, 1, 1]} : vector<2x20x8xf32> to vector<2x16x8xf32>
    %14 = tpu.concatenate %9, %10, %11, %12, %13 in 2 : vector<2x16x8xf32>, vector<2x16x8xf32>, vector<2x16x8xf32>, vector<2x16x8xf32>, vector<2x16x8xf32> -> vector<2x16x40xf32>
    %15 = vector.shape_cast %14 : vector<2x16x40xf32> to vector<32x40xf32>
    %c0_7 = arith.constant 0 : index
    %c0_8 = arith.constant 0 : index
    %16 = vector.load %arg2[%c0_7, %c0_8] : memref<40x32xf32, #tpu.memory_space<vmem>>, vector<40x32xf32>
    %cst_9 = arith.constant dense<0.000000e+00> : vector<32x32xf32>
    %17 = tpu.matmul %15, %16, %cst_9 {dimension_numbers = #tpu.dot_dimension_numbers<[1], [0], [0], [1], [0, 0, 1, 1], [], []>} : vector<32x40xf32>, vector<40x32xf32>, vector<32x32xf32> -> vector<32x32xf32>
    %c0_10 = arith.constant 0 : index
    %c0_11 = arith.constant 0 : index
    %18 = vector.load %arg3[%c0_10, %c0_11] : memref<1x32xf32, #tpu.memory_space<vmem>>, vector<1x32xf32>
    %19 = vector.broadcast %18 : vector<1x32xf32> to vector<32x32xf32>
    %20 = arith.addf %17, %19 : vector<32x32xf32>
    %cst_12 = arith.constant 0.000000e+00 : f32
    %21 = vector.broadcast %cst_12 : f32 to vector<32x32xf32>
    %22 = arith.maximumf %20, %21 : vector<32x32xf32>
    %c0_13 = arith.constant 0 : index
    %c0_14 = arith.constant 0 : index
    %23 = vector.load %arg4[%c0_13, %c0_14] : memref<1x32xf32, #tpu.memory_space<vmem>>, vector<1x32xf32>
    %24 = vector.broadcast %23 : vector<1x32xf32> to vector<32x32xf32>
    %25 = arith.mulf %22, %24 : vector<32x32xf32>
    %c0_15 = arith.constant 0 : index
    %c0_16 = arith.constant 0 : index
    %26 = vector.load %arg5[%c0_15, %c0_16] : memref<1x32xf32, #tpu.memory_space<vmem>>, vector<1x32xf32>
    %27 = vector.broadcast %26 : vector<1x32xf32> to vector<32x32xf32>
    %28 = arith.addf %25, %27 : vector<32x32xf32>
    %29 = vector.shape_cast %28 : vector<32x32xf32> to vector<2x16x32xf32>
    %cst_17 = arith.constant 0.000000e+00 : f32
    %30 = vector.broadcast %cst_17 : f32 to vector<2x4x32xf32>
    %31 = tpu.concatenate %30, %29 in 1 : vector<2x4x32xf32>, vector<2x16x32xf32> -> vector<2x20x32xf32>
    %32 = vector.extract_strided_slice %31 {offsets = [0, 0, 0], sizes = [2, 16, 32], strides = [1, 1, 1]} : vector<2x20x32xf32> to vector<2x16x32xf32>
    %33 = vector.extract_strided_slice %31 {offsets = [0, 1, 0], sizes = [2, 16, 32], strides = [1, 1, 1]} : vector<2x20x32xf32> to vector<2x16x32xf32>
    %34 = vector.extract_strided_slice %31 {offsets = [0, 2, 0], sizes = [2, 16, 32], strides = [1, 1, 1]} : vector<2x20x32xf32> to vector<2x16x32xf32>
    %35 = vector.extract_strided_slice %31 {offsets = [0, 3, 0], sizes = [2, 16, 32], strides = [1, 1, 1]} : vector<2x20x32xf32> to vector<2x16x32xf32>
    %36 = vector.extract_strided_slice %31 {offsets = [0, 4, 0], sizes = [2, 16, 32], strides = [1, 1, 1]} : vector<2x20x32xf32> to vector<2x16x32xf32>
    %37 = tpu.concatenate %32, %33, %34, %35, %36 in 2 : vector<2x16x32xf32>, vector<2x16x32xf32>, vector<2x16x32xf32>, vector<2x16x32xf32>, vector<2x16x32xf32> -> vector<2x16x160xf32>
    %38 = vector.shape_cast %37 : vector<2x16x160xf32> to vector<32x160xf32>
    %c0_18 = arith.constant 0 : index
    %c0_19 = arith.constant 0 : index
    %39 = vector.load %arg6[%c0_18, %c0_19] : memref<160x32xf32, #tpu.memory_space<vmem>>, vector<160x32xf32>
    %cst_20 = arith.constant dense<0.000000e+00> : vector<32x32xf32>
    %40 = tpu.matmul %38, %39, %cst_20 {dimension_numbers = #tpu.dot_dimension_numbers<[1], [0], [0], [1], [0, 0, 1, 1], [], []>} : vector<32x160xf32>, vector<160x32xf32>, vector<32x32xf32> -> vector<32x32xf32>
    %c0_21 = arith.constant 0 : index
    %c0_22 = arith.constant 0 : index
    %41 = vector.load %arg7[%c0_21, %c0_22] : memref<1x32xf32, #tpu.memory_space<vmem>>, vector<1x32xf32>
    %42 = vector.broadcast %41 : vector<1x32xf32> to vector<32x32xf32>
    %43 = arith.addf %40, %42 : vector<32x32xf32>
    %cst_23 = arith.constant 0.000000e+00 : f32
    %44 = vector.broadcast %cst_23 : f32 to vector<32x32xf32>
    %45 = arith.maximumf %43, %44 : vector<32x32xf32>
    %c0_24 = arith.constant 0 : index
    %c0_25 = arith.constant 0 : index
    %46 = vector.load %arg8[%c0_24, %c0_25] : memref<1x32xf32, #tpu.memory_space<vmem>>, vector<1x32xf32>
    %47 = vector.broadcast %46 : vector<1x32xf32> to vector<32x32xf32>
    %48 = arith.mulf %45, %47 : vector<32x32xf32>
    %c0_26 = arith.constant 0 : index
    %c0_27 = arith.constant 0 : index
    %49 = vector.load %arg9[%c0_26, %c0_27] : memref<1x32xf32, #tpu.memory_space<vmem>>, vector<1x32xf32>
    %50 = vector.broadcast %49 : vector<1x32xf32> to vector<32x32xf32>
    %51 = arith.addf %48, %50 : vector<32x32xf32>
    %52 = arith.addf %51, %6 : vector<32x32xf32>
    %cst_28 = arith.constant 0.000000e+00 : f32
    %53 = vector.broadcast %cst_28 : f32 to vector<32x32xf32>
    %54 = arith.maximumf %52, %53 : vector<32x32xf32>
    %55 = vector.shape_cast %54 : vector<32x32xf32> to vector<2x16x32xf32>
    %56 = vector.shape_cast %55 : vector<2x16x32xf32> to vector<32x32xf32>
    %cst_29 = arith.constant 0.000000e+00 : f32
    %57 = vector.broadcast %cst_29 : f32 to vector<2x8x32xf32>
    %58 = tpu.concatenate %57, %55 in 1 : vector<2x8x32xf32>, vector<2x16x32xf32> -> vector<2x24x32xf32>
    %59 = vector.extract_strided_slice %58 {offsets = [0, 0, 0], sizes = [2, 16, 32], strides = [1, 1, 1]} : vector<2x24x32xf32> to vector<2x16x32xf32>
    %60 = vector.extract_strided_slice %58 {offsets = [0, 2, 0], sizes = [2, 16, 32], strides = [1, 1, 1]} : vector<2x24x32xf32> to vector<2x16x32xf32>
    %61 = vector.extract_strided_slice %58 {offsets = [0, 4, 0], sizes = [2, 16, 32], strides = [1, 1, 1]} : vector<2x24x32xf32> to vector<2x16x32xf32>
    %62 = vector.extract_strided_slice %58 {offsets = [0, 6, 0], sizes = [2, 16, 32], strides = [1, 1, 1]} : vector<2x24x32xf32> to vector<2x16x32xf32>
    %63 = vector.extract_strided_slice %58 {offsets = [0, 8, 0], sizes = [2, 16, 32], strides = [1, 1, 1]} : vector<2x24x32xf32> to vector<2x16x32xf32>
    %64 = tpu.concatenate %59, %60, %61, %62, %63 in 2 : vector<2x16x32xf32>, vector<2x16x32xf32>, vector<2x16x32xf32>, vector<2x16x32xf32>, vector<2x16x32xf32> -> vector<2x16x160xf32>
    %65 = vector.shape_cast %64 : vector<2x16x160xf32> to vector<32x160xf32>
    %c0_30 = arith.constant 0 : index
    %c0_31 = arith.constant 0 : index
    %66 = vector.load %arg12[%c0_30, %c0_31] : memref<160x32xf32, #tpu.memory_space<vmem>>, vector<160x32xf32>
    %cst_32 = arith.constant dense<0.000000e+00> : vector<32x32xf32>
    %67 = tpu.matmul %65, %66, %cst_32 {dimension_numbers = #tpu.dot_dimension_numbers<[1], [0], [0], [1], [0, 0, 1, 1], [], []>} : vector<32x160xf32>, vector<160x32xf32>, vector<32x32xf32> -> vector<32x32xf32>
    %c0_33 = arith.constant 0 : index
    %c0_34 = arith.constant 0 : index
    %68 = vector.load %arg13[%c0_33, %c0_34] : memref<1x32xf32, #tpu.memory_space<vmem>>, vector<1x32xf32>
    %69 = vector.broadcast %68 : vector<1x32xf32> to vector<32x32xf32>
    %70 = arith.addf %67, %69 : vector<32x32xf32>
    %cst_35 = arith.constant 0.000000e+00 : f32
    %71 = vector.broadcast %cst_35 : f32 to vector<32x32xf32>
    %72 = arith.maximumf %70, %71 : vector<32x32xf32>
    %c0_36 = arith.constant 0 : index
    %c0_37 = arith.constant 0 : index
    %73 = vector.load %arg14[%c0_36, %c0_37] : memref<1x32xf32, #tpu.memory_space<vmem>>, vector<1x32xf32>
    %74 = vector.broadcast %73 : vector<1x32xf32> to vector<32x32xf32>
    %75 = arith.mulf %72, %74 : vector<32x32xf32>
    %c0_38 = arith.constant 0 : index
    %c0_39 = arith.constant 0 : index
    %76 = vector.load %arg15[%c0_38, %c0_39] : memref<1x32xf32, #tpu.memory_space<vmem>>, vector<1x32xf32>
    %77 = vector.broadcast %76 : vector<1x32xf32> to vector<32x32xf32>
    %78 = arith.addf %75, %77 : vector<32x32xf32>
    %79 = vector.shape_cast %78 : vector<32x32xf32> to vector<2x16x32xf32>
    %cst_40 = arith.constant 0.000000e+00 : f32
    %80 = vector.broadcast %cst_40 : f32 to vector<2x8x32xf32>
    %81 = tpu.concatenate %80, %79 in 1 : vector<2x8x32xf32>, vector<2x16x32xf32> -> vector<2x24x32xf32>
    %82 = vector.extract_strided_slice %81 {offsets = [0, 0, 0], sizes = [2, 16, 32], strides = [1, 1, 1]} : vector<2x24x32xf32> to vector<2x16x32xf32>
    %83 = vector.extract_strided_slice %81 {offsets = [0, 2, 0], sizes = [2, 16, 32], strides = [1, 1, 1]} : vector<2x24x32xf32> to vector<2x16x32xf32>
    %84 = vector.extract_strided_slice %81 {offsets = [0, 4, 0], sizes = [2, 16, 32], strides = [1, 1, 1]} : vector<2x24x32xf32> to vector<2x16x32xf32>
    %85 = vector.extract_strided_slice %81 {offsets = [0, 6, 0], sizes = [2, 16, 32], strides = [1, 1, 1]} : vector<2x24x32xf32> to vector<2x16x32xf32>
    %86 = vector.extract_strided_slice %81 {offsets = [0, 8, 0], sizes = [2, 16, 32], strides = [1, 1, 1]} : vector<2x24x32xf32> to vector<2x16x32xf32>
    %87 = tpu.concatenate %82, %83, %84, %85, %86 in 2 : vector<2x16x32xf32>, vector<2x16x32xf32>, vector<2x16x32xf32>, vector<2x16x32xf32>, vector<2x16x32xf32> -> vector<2x16x160xf32>
    %88 = vector.shape_cast %87 : vector<2x16x160xf32> to vector<32x160xf32>
    %c0_41 = arith.constant 0 : index
    %c0_42 = arith.constant 0 : index
    %89 = vector.load %arg16[%c0_41, %c0_42] : memref<160x32xf32, #tpu.memory_space<vmem>>, vector<160x32xf32>
    %cst_43 = arith.constant dense<0.000000e+00> : vector<32x32xf32>
    %90 = tpu.matmul %88, %89, %cst_43 {dimension_numbers = #tpu.dot_dimension_numbers<[1], [0], [0], [1], [0, 0, 1, 1], [], []>} : vector<32x160xf32>, vector<160x32xf32>, vector<32x32xf32> -> vector<32x32xf32>
    %c0_44 = arith.constant 0 : index
    %c0_45 = arith.constant 0 : index
    %91 = vector.load %arg17[%c0_44, %c0_45] : memref<1x32xf32, #tpu.memory_space<vmem>>, vector<1x32xf32>
    %92 = vector.broadcast %91 : vector<1x32xf32> to vector<32x32xf32>
    %93 = arith.addf %90, %92 : vector<32x32xf32>
    %cst_46 = arith.constant 0.000000e+00 : f32
    %94 = vector.broadcast %cst_46 : f32 to vector<32x32xf32>
    %95 = arith.maximumf %93, %94 : vector<32x32xf32>
    %c0_47 = arith.constant 0 : index
    %c0_48 = arith.constant 0 : index
    %96 = vector.load %arg18[%c0_47, %c0_48] : memref<1x32xf32, #tpu.memory_space<vmem>>, vector<1x32xf32>
    %97 = vector.broadcast %96 : vector<1x32xf32> to vector<32x32xf32>
    %98 = arith.mulf %95, %97 : vector<32x32xf32>
    %c0_49 = arith.constant 0 : index
    %c0_50 = arith.constant 0 : index
    %99 = vector.load %arg19[%c0_49, %c0_50] : memref<1x32xf32, #tpu.memory_space<vmem>>, vector<1x32xf32>
    %100 = vector.broadcast %99 : vector<1x32xf32> to vector<32x32xf32>
    %101 = arith.addf %98, %100 : vector<32x32xf32>
    %102 = arith.addf %101, %56 : vector<32x32xf32>
    %cst_51 = arith.constant 0.000000e+00 : f32
    %103 = vector.broadcast %cst_51 : f32 to vector<32x32xf32>
    %104 = arith.maximumf %102, %103 : vector<32x32xf32>
    %105 = vector.shape_cast %104 : vector<32x32xf32> to vector<2x16x32xf32>
    %106 = vector.shape_cast %105 : vector<2x16x32xf32> to vector<32x32xf32>
    %cst_52 = arith.constant 0.000000e+00 : f32
    %107 = vector.broadcast %cst_52 : f32 to vector<2x16x32xf32>
    %108 = tpu.concatenate %107, %105 in 1 : vector<2x16x32xf32>, vector<2x16x32xf32> -> vector<2x32x32xf32>
    %109 = vector.extract_strided_slice %108 {offsets = [0, 0, 0], sizes = [2, 16, 32], strides = [1, 1, 1]} : vector<2x32x32xf32> to vector<2x16x32xf32>
    %110 = vector.extract_strided_slice %108 {offsets = [0, 4, 0], sizes = [2, 16, 32], strides = [1, 1, 1]} : vector<2x32x32xf32> to vector<2x16x32xf32>
    %111 = vector.extract_strided_slice %108 {offsets = [0, 8, 0], sizes = [2, 16, 32], strides = [1, 1, 1]} : vector<2x32x32xf32> to vector<2x16x32xf32>
    %112 = vector.extract_strided_slice %108 {offsets = [0, 12, 0], sizes = [2, 16, 32], strides = [1, 1, 1]} : vector<2x32x32xf32> to vector<2x16x32xf32>
    %113 = vector.extract_strided_slice %108 {offsets = [0, 16, 0], sizes = [2, 16, 32], strides = [1, 1, 1]} : vector<2x32x32xf32> to vector<2x16x32xf32>
    %114 = tpu.concatenate %109, %110, %111, %112, %113 in 2 : vector<2x16x32xf32>, vector<2x16x32xf32>, vector<2x16x32xf32>, vector<2x16x32xf32>, vector<2x16x32xf32> -> vector<2x16x160xf32>
    %115 = vector.shape_cast %114 : vector<2x16x160xf32> to vector<32x160xf32>
    %c0_53 = arith.constant 0 : index
    %c0_54 = arith.constant 0 : index
    %116 = vector.load %arg20[%c0_53, %c0_54] : memref<160x32xf32, #tpu.memory_space<vmem>>, vector<160x32xf32>
    %cst_55 = arith.constant dense<0.000000e+00> : vector<32x32xf32>
    %117 = tpu.matmul %115, %116, %cst_55 {dimension_numbers = #tpu.dot_dimension_numbers<[1], [0], [0], [1], [0, 0, 1, 1], [], []>} : vector<32x160xf32>, vector<160x32xf32>, vector<32x32xf32> -> vector<32x32xf32>
    %c0_56 = arith.constant 0 : index
    %c0_57 = arith.constant 0 : index
    %118 = vector.load %arg21[%c0_56, %c0_57] : memref<1x32xf32, #tpu.memory_space<vmem>>, vector<1x32xf32>
    %119 = vector.broadcast %118 : vector<1x32xf32> to vector<32x32xf32>
    %120 = arith.addf %117, %119 : vector<32x32xf32>
    %cst_58 = arith.constant 0.000000e+00 : f32
    %121 = vector.broadcast %cst_58 : f32 to vector<32x32xf32>
    %122 = arith.maximumf %120, %121 : vector<32x32xf32>
    %c0_59 = arith.constant 0 : index
    %c0_60 = arith.constant 0 : index
    %123 = vector.load %arg22[%c0_59, %c0_60] : memref<1x32xf32, #tpu.memory_space<vmem>>, vector<1x32xf32>
    %124 = vector.broadcast %123 : vector<1x32xf32> to vector<32x32xf32>
    %125 = arith.mulf %122, %124 : vector<32x32xf32>
    %c0_61 = arith.constant 0 : index
    %c0_62 = arith.constant 0 : index
    %126 = vector.load %arg23[%c0_61, %c0_62] : memref<1x32xf32, #tpu.memory_space<vmem>>, vector<1x32xf32>
    %127 = vector.broadcast %126 : vector<1x32xf32> to vector<32x32xf32>
    %128 = arith.addf %125, %127 : vector<32x32xf32>
    %129 = vector.shape_cast %128 : vector<32x32xf32> to vector<2x16x32xf32>
    %cst_63 = arith.constant 0.000000e+00 : f32
    %130 = vector.broadcast %cst_63 : f32 to vector<2x16x32xf32>
    %131 = tpu.concatenate %130, %129 in 1 : vector<2x16x32xf32>, vector<2x16x32xf32> -> vector<2x32x32xf32>
    %132 = vector.extract_strided_slice %131 {offsets = [0, 0, 0], sizes = [2, 16, 32], strides = [1, 1, 1]} : vector<2x32x32xf32> to vector<2x16x32xf32>
    %133 = vector.extract_strided_slice %131 {offsets = [0, 4, 0], sizes = [2, 16, 32], strides = [1, 1, 1]} : vector<2x32x32xf32> to vector<2x16x32xf32>
    %134 = vector.extract_strided_slice %131 {offsets = [0, 8, 0], sizes = [2, 16, 32], strides = [1, 1, 1]} : vector<2x32x32xf32> to vector<2x16x32xf32>
    %135 = vector.extract_strided_slice %131 {offsets = [0, 12, 0], sizes = [2, 16, 32], strides = [1, 1, 1]} : vector<2x32x32xf32> to vector<2x16x32xf32>
    %136 = vector.extract_strided_slice %131 {offsets = [0, 16, 0], sizes = [2, 16, 32], strides = [1, 1, 1]} : vector<2x32x32xf32> to vector<2x16x32xf32>
    %137 = tpu.concatenate %132, %133, %134, %135, %136 in 2 : vector<2x16x32xf32>, vector<2x16x32xf32>, vector<2x16x32xf32>, vector<2x16x32xf32>, vector<2x16x32xf32> -> vector<2x16x160xf32>
    %138 = vector.shape_cast %137 : vector<2x16x160xf32> to vector<32x160xf32>
    %c0_64 = arith.constant 0 : index
    %c0_65 = arith.constant 0 : index
    %139 = vector.load %arg24[%c0_64, %c0_65] : memref<160x32xf32, #tpu.memory_space<vmem>>, vector<160x32xf32>
    %cst_66 = arith.constant dense<0.000000e+00> : vector<32x32xf32>
    %140 = tpu.matmul %138, %139, %cst_66 {dimension_numbers = #tpu.dot_dimension_numbers<[1], [0], [0], [1], [0, 0, 1, 1], [], []>} : vector<32x160xf32>, vector<160x32xf32>, vector<32x32xf32> -> vector<32x32xf32>
    %c0_67 = arith.constant 0 : index
    %c0_68 = arith.constant 0 : index
    %141 = vector.load %arg25[%c0_67, %c0_68] : memref<1x32xf32, #tpu.memory_space<vmem>>, vector<1x32xf32>
    %142 = vector.broadcast %141 : vector<1x32xf32> to vector<32x32xf32>
    %143 = arith.addf %140, %142 : vector<32x32xf32>
    %cst_69 = arith.constant 0.000000e+00 : f32
    %144 = vector.broadcast %cst_69 : f32 to vector<32x32xf32>
    %145 = arith.maximumf %143, %144 : vector<32x32xf32>
    %c0_70 = arith.constant 0 : index
    %c0_71 = arith.constant 0 : index
    %146 = vector.load %arg26[%c0_70, %c0_71] : memref<1x32xf32, #tpu.memory_space<vmem>>, vector<1x32xf32>
    %147 = vector.broadcast %146 : vector<1x32xf32> to vector<32x32xf32>
    %148 = arith.mulf %145, %147 : vector<32x32xf32>
    %c0_72 = arith.constant 0 : index
    %c0_73 = arith.constant 0 : index
    %149 = vector.load %arg27[%c0_72, %c0_73] : memref<1x32xf32, #tpu.memory_space<vmem>>, vector<1x32xf32>
    %150 = vector.broadcast %149 : vector<1x32xf32> to vector<32x32xf32>
    %151 = arith.addf %148, %150 : vector<32x32xf32>
    %152 = arith.addf %151, %106 : vector<32x32xf32>
    %cst_74 = arith.constant 0.000000e+00 : f32
    %153 = vector.broadcast %cst_74 : f32 to vector<32x32xf32>
    %154 = arith.maximumf %152, %153 : vector<32x32xf32>
    %155 = vector.shape_cast %154 : vector<32x32xf32> to vector<2x16x32xf32>
    %156 = vector.shape_cast %155 : vector<2x16x32xf32> to vector<32x32xf32>
    %cst_75 = arith.constant 0.000000e+00 : f32
    %157 = vector.broadcast %cst_75 : f32 to vector<2x32x32xf32>
    %158 = tpu.concatenate %157, %155 in 1 : vector<2x32x32xf32>, vector<2x16x32xf32> -> vector<2x48x32xf32>
    %159 = vector.extract_strided_slice %158 {offsets = [0, 0, 0], sizes = [2, 16, 32], strides = [1, 1, 1]} : vector<2x48x32xf32> to vector<2x16x32xf32>
    %160 = vector.extract_strided_slice %158 {offsets = [0, 8, 0], sizes = [2, 16, 32], strides = [1, 1, 1]} : vector<2x48x32xf32> to vector<2x16x32xf32>
    %161 = vector.extract_strided_slice %158 {offsets = [0, 16, 0], sizes = [2, 16, 32], strides = [1, 1, 1]} : vector<2x48x32xf32> to vector<2x16x32xf32>
    %162 = vector.extract_strided_slice %158 {offsets = [0, 24, 0], sizes = [2, 16, 32], strides = [1, 1, 1]} : vector<2x48x32xf32> to vector<2x16x32xf32>
    %163 = vector.extract_strided_slice %158 {offsets = [0, 32, 0], sizes = [2, 16, 32], strides = [1, 1, 1]} : vector<2x48x32xf32> to vector<2x16x32xf32>
    %164 = tpu.concatenate %159, %160, %161, %162, %163 in 2 : vector<2x16x32xf32>, vector<2x16x32xf32>, vector<2x16x32xf32>, vector<2x16x32xf32>, vector<2x16x32xf32> -> vector<2x16x160xf32>
    %165 = vector.shape_cast %164 : vector<2x16x160xf32> to vector<32x160xf32>
    %c0_76 = arith.constant 0 : index
    %c0_77 = arith.constant 0 : index
    %166 = vector.load %arg28[%c0_76, %c0_77] : memref<160x32xf32, #tpu.memory_space<vmem>>, vector<160x32xf32>
    %cst_78 = arith.constant dense<0.000000e+00> : vector<32x32xf32>
    %167 = tpu.matmul %165, %166, %cst_78 {dimension_numbers = #tpu.dot_dimension_numbers<[1], [0], [0], [1], [0, 0, 1, 1], [], []>} : vector<32x160xf32>, vector<160x32xf32>, vector<32x32xf32> -> vector<32x32xf32>
    %c0_79 = arith.constant 0 : index
    %c0_80 = arith.constant 0 : index
    %168 = vector.load %arg29[%c0_79, %c0_80] : memref<1x32xf32, #tpu.memory_space<vmem>>, vector<1x32xf32>
    %169 = vector.broadcast %168 : vector<1x32xf32> to vector<32x32xf32>
    %170 = arith.addf %167, %169 : vector<32x32xf32>
    %cst_81 = arith.constant 0.000000e+00 : f32
    %171 = vector.broadcast %cst_81 : f32 to vector<32x32xf32>
    %172 = arith.maximumf %170, %171 : vector<32x32xf32>
    %c0_82 = arith.constant 0 : index
    %c0_83 = arith.constant 0 : index
    %173 = vector.load %arg30[%c0_82, %c0_83] : memref<1x32xf32, #tpu.memory_space<vmem>>, vector<1x32xf32>
    %174 = vector.broadcast %173 : vector<1x32xf32> to vector<32x32xf32>
    %175 = arith.mulf %172, %174 : vector<32x32xf32>
    %c0_84 = arith.constant 0 : index
    %c0_85 = arith.constant 0 : index
    %176 = vector.load %arg31[%c0_84, %c0_85] : memref<1x32xf32, #tpu.memory_space<vmem>>, vector<1x32xf32>
    %177 = vector.broadcast %176 : vector<1x32xf32> to vector<32x32xf32>
    %178 = arith.addf %175, %177 : vector<32x32xf32>
    %179 = vector.shape_cast %178 : vector<32x32xf32> to vector<2x16x32xf32>
    %cst_86 = arith.constant 0.000000e+00 : f32
    %180 = vector.broadcast %cst_86 : f32 to vector<2x32x32xf32>
    %181 = tpu.concatenate %180, %179 in 1 : vector<2x32x32xf32>, vector<2x16x32xf32> -> vector<2x48x32xf32>
    %182 = vector.extract_strided_slice %181 {offsets = [0, 0, 0], sizes = [2, 16, 32], strides = [1, 1, 1]} : vector<2x48x32xf32> to vector<2x16x32xf32>
    %183 = vector.extract_strided_slice %181 {offsets = [0, 8, 0], sizes = [2, 16, 32], strides = [1, 1, 1]} : vector<2x48x32xf32> to vector<2x16x32xf32>
    %184 = vector.extract_strided_slice %181 {offsets = [0, 16, 0], sizes = [2, 16, 32], strides = [1, 1, 1]} : vector<2x48x32xf32> to vector<2x16x32xf32>
    %185 = vector.extract_strided_slice %181 {offsets = [0, 24, 0], sizes = [2, 16, 32], strides = [1, 1, 1]} : vector<2x48x32xf32> to vector<2x16x32xf32>
    %186 = vector.extract_strided_slice %181 {offsets = [0, 32, 0], sizes = [2, 16, 32], strides = [1, 1, 1]} : vector<2x48x32xf32> to vector<2x16x32xf32>
    %187 = tpu.concatenate %182, %183, %184, %185, %186 in 2 : vector<2x16x32xf32>, vector<2x16x32xf32>, vector<2x16x32xf32>, vector<2x16x32xf32>, vector<2x16x32xf32> -> vector<2x16x160xf32>
    %188 = vector.shape_cast %187 : vector<2x16x160xf32> to vector<32x160xf32>
    %c0_87 = arith.constant 0 : index
    %c0_88 = arith.constant 0 : index
    %189 = vector.load %arg32[%c0_87, %c0_88] : memref<160x32xf32, #tpu.memory_space<vmem>>, vector<160x32xf32>
    %cst_89 = arith.constant dense<0.000000e+00> : vector<32x32xf32>
    %190 = tpu.matmul %188, %189, %cst_89 {dimension_numbers = #tpu.dot_dimension_numbers<[1], [0], [0], [1], [0, 0, 1, 1], [], []>} : vector<32x160xf32>, vector<160x32xf32>, vector<32x32xf32> -> vector<32x32xf32>
    %c0_90 = arith.constant 0 : index
    %c0_91 = arith.constant 0 : index
    %191 = vector.load %arg33[%c0_90, %c0_91] : memref<1x32xf32, #tpu.memory_space<vmem>>, vector<1x32xf32>
    %192 = vector.broadcast %191 : vector<1x32xf32> to vector<32x32xf32>
    %193 = arith.addf %190, %192 : vector<32x32xf32>
    %cst_92 = arith.constant 0.000000e+00 : f32
    %194 = vector.broadcast %cst_92 : f32 to vector<32x32xf32>
    %195 = arith.maximumf %193, %194 : vector<32x32xf32>
    %c0_93 = arith.constant 0 : index
    %c0_94 = arith.constant 0 : index
    %196 = vector.load %arg34[%c0_93, %c0_94] : memref<1x32xf32, #tpu.memory_space<vmem>>, vector<1x32xf32>
    %197 = vector.broadcast %196 : vector<1x32xf32> to vector<32x32xf32>
    %198 = arith.mulf %195, %197 : vector<32x32xf32>
    %c0_95 = arith.constant 0 : index
    %c0_96 = arith.constant 0 : index
    %199 = vector.load %arg35[%c0_95, %c0_96] : memref<1x32xf32, #tpu.memory_space<vmem>>, vector<1x32xf32>
    %200 = vector.broadcast %199 : vector<1x32xf32> to vector<32x32xf32>
    %201 = arith.addf %198, %200 : vector<32x32xf32>
    %202 = arith.addf %201, %156 : vector<32x32xf32>
    %cst_97 = arith.constant 0.000000e+00 : f32
    %203 = vector.broadcast %cst_97 : f32 to vector<32x32xf32>
    %204 = arith.maximumf %202, %203 : vector<32x32xf32>
    %205 = vector.shape_cast %204 : vector<32x32xf32> to vector<2x16x32xf32>
    %206 = vector.shape_cast %205 : vector<2x16x32xf32> to vector<32x32xf32>
    %c0_98 = arith.constant 0 : index
    %c0_99 = arith.constant 0 : index
    %207 = vector.load %arg36[%c0_98, %c0_99] : memref<32x128xf32, #tpu.memory_space<vmem>>, vector<32x128xf32>
    %cst_100 = arith.constant dense<0.000000e+00> : vector<32x128xf32>
    %208 = tpu.matmul %206, %207, %cst_100 {dimension_numbers = #tpu.dot_dimension_numbers<[1], [0], [0], [1], [0, 0, 1, 1], [], []>} : vector<32x32xf32>, vector<32x128xf32>, vector<32x128xf32> -> vector<32x128xf32>
    %c0_101 = arith.constant 0 : index
    %c0_102 = arith.constant 0 : index
    %209 = vector.load %arg37[%c0_101, %c0_102] : memref<1x128xf32, #tpu.memory_space<vmem>>, vector<1x128xf32>
    %210 = vector.broadcast %209 : vector<1x128xf32> to vector<32x128xf32>
    %211 = arith.addf %208, %210 : vector<32x128xf32>
    %212 = vector.shape_cast %211 : vector<32x128xf32> to vector<2x16x128xf32>
    %c0_103 = arith.constant 0 : index
    %c0_104 = arith.constant 0 : index
    %c0_105 = arith.constant 0 : index
    %213 = vector.load %arg38[%c0_103, %c0_104, %c0_105] : memref<2x16x128xf32, #tpu.memory_space<vmem>>, vector<2x16x128xf32>
    tpu.vector_store %arg38[%c0_103, %c0_104, %c0_105], %212 {strides = array<i32>} : memref<2x16x128xf32, #tpu.memory_space<vmem>>, vector<2x16x128xf32>,
    return
  }
  func.func @transform_0(%arg0: i32) -> (i32, i32, i32) {
    %c0_i32 = arith.constant 0 : i32
    %c0_i32_0 = arith.constant 0 : i32
    %c0_i32_1 = arith.constant 0 : i32
    return %arg0, %c0_i32, %c0_i32_0 : i32, i32, i32
  }
  func.func @transform_1(%arg0: i32) -> (i32, i32) {
    %c0_i32 = arith.constant 0 : i32
    %c0_i32_0 = arith.constant 0 : i32
    %c0_i32_1 = arith.constant 0 : i32
    return %c0_i32, %c0_i32_0 : i32, i32
  }
  func.func @transform_2(%arg0: i32) -> (i32, i32) {
    %c0_i32 = arith.constant 0 : i32
    %c0_i32_0 = arith.constant 0 : i32
    %c0_i32_1 = arith.constant 0 : i32
    return %c0_i32, %c0_i32_0 : i32, i32
  }
  func.func @transform_3(%arg0: i32) -> (i32, i32) {
    %c0_i32 = arith.constant 0 : i32
    %c0_i32_0 = arith.constant 0 : i32
    %c0_i32_1 = arith.constant 0 : i32
    return %c0_i32, %c0_i32_0 : i32, i32
  }
  func.func @transform_4(%arg0: i32) -> (i32, i32) {
    %c0_i32 = arith.constant 0 : i32
    %c0_i32_0 = arith.constant 0 : i32
    %c0_i32_1 = arith.constant 0 : i32
    return %c0_i32, %c0_i32_0 : i32, i32
  }
  func.func @transform_5(%arg0: i32) -> (i32, i32) {
    %c0_i32 = arith.constant 0 : i32
    %c0_i32_0 = arith.constant 0 : i32
    %c0_i32_1 = arith.constant 0 : i32
    return %c0_i32, %c0_i32_0 : i32, i32
  }
  func.func @transform_6(%arg0: i32) -> (i32, i32) {
    %c0_i32 = arith.constant 0 : i32
    %c0_i32_0 = arith.constant 0 : i32
    %c0_i32_1 = arith.constant 0 : i32
    return %c0_i32, %c0_i32_0 : i32, i32
  }
  func.func @transform_7(%arg0: i32) -> (i32, i32) {
    %c0_i32 = arith.constant 0 : i32
    %c0_i32_0 = arith.constant 0 : i32
    %c0_i32_1 = arith.constant 0 : i32
    return %c0_i32, %c0_i32_0 : i32, i32
  }
  func.func @transform_8(%arg0: i32) -> (i32, i32) {
    %c0_i32 = arith.constant 0 : i32
    %c0_i32_0 = arith.constant 0 : i32
    %c0_i32_1 = arith.constant 0 : i32
    return %c0_i32, %c0_i32_0 : i32, i32
  }
  func.func @transform_9(%arg0: i32) -> (i32, i32) {
    %c0_i32 = arith.constant 0 : i32
    %c0_i32_0 = arith.constant 0 : i32
    %c0_i32_1 = arith.constant 0 : i32
    return %c0_i32, %c0_i32_0 : i32, i32
  }
  func.func @transform_10(%arg0: i32) -> (i32, i32) {
    %c0_i32 = arith.constant 0 : i32
    %c0_i32_0 = arith.constant 0 : i32
    %c0_i32_1 = arith.constant 0 : i32
    return %c0_i32, %c0_i32_0 : i32, i32
  }
  func.func @transform_11(%arg0: i32) -> (i32, i32) {
    %c0_i32 = arith.constant 0 : i32
    %c0_i32_0 = arith.constant 0 : i32
    %c0_i32_1 = arith.constant 0 : i32
    return %c0_i32, %c0_i32_0 : i32, i32
  }
  func.func @transform_12(%arg0: i32) -> (i32, i32) {
    %c0_i32 = arith.constant 0 : i32
    %c0_i32_0 = arith.constant 0 : i32
    %c0_i32_1 = arith.constant 0 : i32
    return %c0_i32, %c0_i32_0 : i32, i32
  }
  func.func @transform_13(%arg0: i32) -> (i32, i32) {
    %c0_i32 = arith.constant 0 : i32
    %c0_i32_0 = arith.constant 0 : i32
    %c0_i32_1 = arith.constant 0 : i32
    return %c0_i32, %c0_i32_0 : i32, i32
  }
  func.func @transform_14(%arg0: i32) -> (i32, i32) {
    %c0_i32 = arith.constant 0 : i32
    %c0_i32_0 = arith.constant 0 : i32
    %c0_i32_1 = arith.constant 0 : i32
    return %c0_i32, %c0_i32_0 : i32, i32
  }
  func.func @transform_15(%arg0: i32) -> (i32, i32) {
    %c0_i32 = arith.constant 0 : i32
    %c0_i32_0 = arith.constant 0 : i32
    %c0_i32_1 = arith.constant 0 : i32
    return %c0_i32, %c0_i32_0 : i32, i32
  }
  func.func @transform_16(%arg0: i32) -> (i32, i32) {
    %c0_i32 = arith.constant 0 : i32
    %c0_i32_0 = arith.constant 0 : i32
    %c0_i32_1 = arith.constant 0 : i32
    return %c0_i32, %c0_i32_0 : i32, i32
  }
  func.func @transform_17(%arg0: i32) -> (i32, i32) {
    %c0_i32 = arith.constant 0 : i32
    %c0_i32_0 = arith.constant 0 : i32
    %c0_i32_1 = arith.constant 0 : i32
    return %c0_i32, %c0_i32_0 : i32, i32
  }
  func.func @transform_18(%arg0: i32) -> (i32, i32) {
    %c0_i32 = arith.constant 0 : i32
    %c0_i32_0 = arith.constant 0 : i32
    %c0_i32_1 = arith.constant 0 : i32
    return %c0_i32, %c0_i32_0 : i32, i32
  }
  func.func @transform_19(%arg0: i32) -> (i32, i32) {
    %c0_i32 = arith.constant 0 : i32
    %c0_i32_0 = arith.constant 0 : i32
    %c0_i32_1 = arith.constant 0 : i32
    return %c0_i32, %c0_i32_0 : i32, i32
  }
  func.func @transform_20(%arg0: i32) -> (i32, i32) {
    %c0_i32 = arith.constant 0 : i32
    %c0_i32_0 = arith.constant 0 : i32
    %c0_i32_1 = arith.constant 0 : i32
    return %c0_i32, %c0_i32_0 : i32, i32
  }
  func.func @transform_21(%arg0: i32) -> (i32, i32) {
    %c0_i32 = arith.constant 0 : i32
    %c0_i32_0 = arith.constant 0 : i32
    %c0_i32_1 = arith.constant 0 : i32
    return %c0_i32, %c0_i32_0 : i32, i32
  }
  func.func @transform_22(%arg0: i32) -> (i32, i32) {
    %c0_i32 = arith.constant 0 : i32
    %c0_i32_0 = arith.constant 0 : i32
    %c0_i32_1 = arith.constant 0 : i32
    return %c0_i32, %c0_i32_0 : i32, i32
  }
  func.func @transform_23(%arg0: i32) -> (i32, i32) {
    %c0_i32 = arith.constant 0 : i32
    %c0_i32_0 = arith.constant 0 : i32
    %c0_i32_1 = arith.constant 0 : i32
    return %c0_i32, %c0_i32_0 : i32, i32
  }
  func.func @transform_24(%arg0: i32) -> (i32, i32) {
    %c0_i32 = arith.constant 0 : i32
    %c0_i32_0 = arith.constant 0 : i32
    %c0_i32_1 = arith.constant 0 : i32
    return %c0_i32, %c0_i32_0 : i32, i32
  }
  func.func @transform_25(%arg0: i32) -> (i32, i32) {
    %c0_i32 = arith.constant 0 : i32
    %c0_i32_0 = arith.constant 0 : i32
    %c0_i32_1 = arith.constant 0 : i32
    return %c0_i32, %c0_i32_0 : i32, i32
  }
  func.func @transform_26(%arg0: i32) -> (i32, i32) {
    %c0_i32 = arith.constant 0 : i32
    %c0_i32_0 = arith.constant 0 : i32
    %c0_i32_1 = arith.constant 0 : i32
    return %c0_i32, %c0_i32_0 : i32, i32
  }
  func.func @transform_27(%arg0: i32) -> (i32, i32) {
    %c0_i32 = arith.constant 0 : i32
    %c0_i32_0 = arith.constant 0 : i32
    %c0_i32_1 = arith.constant 0 : i32
    return %c0_i32, %c0_i32_0 : i32, i32
  }
  func.func @transform_28(%arg0: i32) -> (i32, i32) {
    %c0_i32 = arith.constant 0 : i32
    %c0_i32_0 = arith.constant 0 : i32
    %c0_i32_1 = arith.constant 0 : i32
    return %c0_i32, %c0_i32_0 : i32, i32
  }
  func.func @transform_29(%arg0: i32) -> (i32, i32) {
    %c0_i32 = arith.constant 0 : i32
    %c0_i32_0 = arith.constant 0 : i32
    %c0_i32_1 = arith.constant 0 : i32
    return %c0_i32, %c0_i32_0 : i32, i32
  }
  func.func @transform_30(%arg0: i32) -> (i32, i32) {
    %c0_i32 = arith.constant 0 : i32
    %c0_i32_0 = arith.constant 0 : i32
    %c0_i32_1 = arith.constant 0 : i32
    return %c0_i32, %c0_i32_0 : i32, i32
  }
  func.func @transform_31(%arg0: i32) -> (i32, i32) {
    %c0_i32 = arith.constant 0 : i32
    %c0_i32_0 = arith.constant 0 : i32
    %c0_i32_1 = arith.constant 0 : i32
    return %c0_i32, %c0_i32_0 : i32, i32
  }
  func.func @transform_32(%arg0: i32) -> (i32, i32) {
    %c0_i32 = arith.constant 0 : i32
    %c0_i32_0 = arith.constant 0 : i32
    %c0_i32_1 = arith.constant 0 : i32
    return %c0_i32, %c0_i32_0 : i32, i32
  }
  func.func @transform_33(%arg0: i32) -> (i32, i32) {
    %c0_i32 = arith.constant 0 : i32
    %c0_i32_0 = arith.constant 0 : i32
    %c0_i32_1 = arith.constant 0 : i32
    return %c0_i32, %c0_i32_0 : i32, i32
  }
  func.func @transform_34(%arg0: i32) -> (i32, i32) {
    %c0_i32 = arith.constant 0 : i32
    %c0_i32_0 = arith.constant 0 : i32
    %c0_i32_1 = arith.constant 0 : i32
    return %c0_i32, %c0_i32_0 : i32, i32
  }
  func.func @transform_35(%arg0: i32) -> (i32, i32) {
    %c0_i32 = arith.constant 0 : i32
    %c0_i32_0 = arith.constant 0 : i32
    %c0_i32_1 = arith.constant 0 : i32
    return %c0_i32, %c0_i32_0 : i32, i32
  }
  func.func @transform_36(%arg0: i32) -> (i32, i32) {
    %c0_i32 = arith.constant 0 : i32
    %c0_i32_0 = arith.constant 0 : i32
    %c0_i32_1 = arith.constant 0 : i32
    return %c0_i32, %c0_i32_0 : i32, i32
  }
  func.func @transform_37(%arg0: i32) -> (i32, i32, i32) {
    %c0_i32 = arith.constant 0 : i32
    %c0_i32_0 = arith.constant 0 : i32
    %c0_i32_1 = arith.constant 0 : i32
    return %arg0, %c0_i32, %c0_i32_0 : i32, i32, i32
  }
}

</mosaic_0001>

<bundles_post_ra>
// kernel: tpu_custom_call.1
= control target key start
LH: loop header
LB: loop body
LE: loop exit
PB: predicated region body
PF: predicated region fallthrough
CT: control target
= control target key end

     0   :  { %s2563_s6 = smov 1   ;;  %s2564_s10 = smov 2   ;;  %s3521_s0 = inlined_call_operand.smem [shape: u32[38], index: -1, kind: input, shape index: {}] }
   0x1   :  { %s2618_s5 = sld [smem:[%s3521_s0]]   ;;  %s2565_s14 = smov 3  }
   0x2   :  { %s2623_s9 = sld [smem:[%s3521_s0 + %s2563_s6]]   ;;  %s2566_s18 = smov 4  }
   0x3   :  { %s2628_s13 = sld [smem:[%s3521_s0 + %s2564_s10]]   ;;  %s2567_s22 = smov 5  }
   0x4   :  { %s2633_s17 = sld [smem:[%s3521_s0 + %s2565_s14]]   ;;  %s2568_s26 = smov 6  }
   0x5   :  { %s2638_s21 = sld [smem:[%s3521_s0 + %s2566_s18]]   ;;  %s2569_s30 = smov 7  }
   0x6   :  { %s2643_s25 = sld [smem:[%s3521_s0 + %s2567_s22]]   ;;  %s2570_s4 = smov 8  }
   0x7   :  { %s2648_s29 = sld [smem:[%s3521_s0 + %s2568_s26]]   ;;  %s2571_s10 = smov 9  }
   0x8   :  { %s2653_s3 = sld [smem:[%s3521_s0 + %s2569_s30]]   ;;  %s2572_s15 = smov 10  }
   0x9   :  { %s2658_s8 = sld [smem:[%s3521_s0 + %s2570_s4]]   ;;  %s2573_s20 = smov 11  }
   0xa   :  { %s2663_s14 = sld [smem:[%s3521_s0 + %s2571_s10]]   ;;  %s2574_s26 = smov 12  }
   0xb   :  { %s2668_s19 = sld [smem:[%s3521_s0 + %s2572_s15]]   ;;  %s2575_s1 = smov 13  }
   0xc   :  { %s2673_s24 = sld [smem:[%s3521_s0 + %s2573_s20]]   ;;  %s2576_s7 = smov 14  }
   0xd   :  { %s2678_s30 = sld [smem:[%s3521_s0 + %s2574_s26]]   ;;  %s2577_s15 = smov 15  }
   0xe   :  { %s2683_s6 = sld [smem:[%s3521_s0 + %s2575_s1]]   ;;  %s2578_s22 = smov 16  }
   0xf   :  { %s2688_s12 = sld [smem:[%s3521_s0 + %s2576_s7]]   ;;  %s2579_s28 = smov 17  }
  0x10   :  { %s2693_s20 = sld [smem:[%s3521_s0 + %s2577_s15]]   ;;  %s2580_s7 = smov 18  }
  0x11   :  { %s2698_s27 = sld [smem:[%s3521_s0 + %s2578_s22]]   ;;  %s2581_s15 = smov 19  }
  0x12   :  { %s2703_s4 = sld [smem:[%s3521_s0 + %s2579_s28]]   ;;  %s2582_s22 = smov 20  }
  0x13   :  { %s2583_s28 = smov 21  }
  0x14   :  { %3526 = sst [smem:[#allocation5_spill]] %s2683_s6 }
  0x15   :  { %3527 = sst [smem:[#allocation6_spill]] %s2688_s12 }
  0x16   :  { %s2708_s12 = sld [smem:[%s3521_s0 + %s2580_s7]]   ;;  %s2584_s7 = smov 22  }
  0x17   :  { %3528 = sst [smem:[#allocation7_spill]] %s2698_s27 }
  0x18   :  { %3529 = sst [smem:[#allocation8_spill]] %s2703_s4 }
  0x19   :  { %s2713_s6 = sld [smem:[%s3521_s0 + %s2581_s15]]   ;;  %s2585_s15 = smov 23  }
  0x1a   :  { %s2718_s27 = sld [smem:[%s3521_s0 + %s2582_s22]]   ;;  %s2586_s22 = smov 24  }
  0x1b   :  { %s2723_s4 = sld [smem:[%s3521_s0 + %s2583_s28]]   ;;  %s2587_s28 = smov 25  }
  0x1c   :  { %3530 = sst [smem:[#allocation9_spill]] %s2708_s12 }
  0x1d   :  { %s2728_s12 = sld [smem:[%s3521_s0 + %s2584_s7]]   ;;  %s2588_s7 = smov 26  }
  0x1f   :  { %3531 = sst [smem:[#allocation10_spill]] %s2713_s6 }
  0x20   :  { %3532 = sst [smem:[#allocation11_spill]] %s2718_s27 }
  0x21   :  { %3533 = sst [smem:[#allocation12_spill]] %s2723_s4 }
  0x22   :  { %s2733_s6 = sld [smem:[%s3521_s0 + %s2585_s15]]   ;;  %s2589_s15 = smov 27  }
  0x23   :  { %3534 = sst [smem:[#allocation13_spill]] %s2728_s12 }
  0x24   :  { %s2738_s27 = sld [smem:[%s3521_s0 + %s2586_s22]]   ;;  %s2590_s22 = smov 28  }
  0x25   :  { %s2743_s4 = sld [smem:[%s3521_s0 + %s2587_s28]]   ;;  %s2591_s28 = smov 29  }
  0x26   :  { %s2748_s12 = sld [smem:[%s3521_s0 + %s2588_s7]]   ;;  %s2592_s7 = smov 30  }
  0x28   :  { %3535 = sst [smem:[#allocation14_spill]] %s2733_s6 }
  0x29   :  { %s2753_s6 = sld [smem:[%s3521_s0 + %s2589_s15]]   ;;  %s2593_s15 = smov 31  }
  0x2a   :  { %3536 = sst [smem:[#allocation15_spill]] %s2738_s27 }
  0x2b   :  { %3537 = sst [smem:[#allocation16_spill]] %s2743_s4 }
  0x2c   :  { %3538 = sst [smem:[#allocation17_spill]] %s2748_s12 }
  0x2d   :  { %s2758_s27 = sld [smem:[%s3521_s0 + %s2590_s22]]   ;;  %s2594_s22 = smov 32  }
  0x2e   :  { %s2763_s4 = sld [smem:[%s3521_s0 + %s2591_s28]]   ;;  %s2595_s28 = smov 33  }
  0x2f   :  { %3539 = sst [smem:[#allocation18_spill]] %s2753_s6 }
  0x30   :  { %s2768_s12 = sld [smem:[%s3521_s0 + %s2592_s7]]   ;;  %s2596_s7 = smov 34  }
  0x31   :  { %s2773_s6 = sld [smem:[%s3521_s0 + %s2593_s15]]   ;;  %s2597_s15 = smov 35  }
  0x33   :  { %3540 = sst [smem:[#allocation19_spill]] %s2758_s27 }
  0x34   :  { %3541 = sst [smem:[#allocation20_spill]] %s2763_s4 }
  0x35   :  { %s2778_s27 = sld [smem:[%s3521_s0 + %s2594_s22]]   ;;  %s2598_s22 = smov 36  }
  0x36   :  { %3542 = sst [smem:[#allocation21_spill]] %s2768_s12 }
  0x37   :  { %3543 = sst [smem:[#allocation22_spill]] %s2773_s6 }
  0x38   :  { %s2783_s4 = sld [smem:[%s3521_s0 + %s2595_s28]]   ;;  %s2599_s28 = smov 37  }
  0x39   :  { %s2788_s12 = sld [smem:[%s3521_s0 + %s2596_s7]]  }
  0x3a   :  { %s2793_s6 = sld [smem:[%s3521_s0 + %s2597_s15]]  }
  0x3b   :  { %3544 = sst [smem:[#allocation23_spill]] %s2778_s27 }
  0x3c   :  { %s2798_s27 = sld [smem:[%s3521_s0 + %s2598_s22]]  }
  0x3e   :  { %3545 = sst [smem:[#allocation24_spill]] %s2783_s4 }
  0x3f   :  { %s2803_s4 = sld [smem:[%s3521_s0 + %s2599_s28]]  }
  0x40   :  { %v155_v0 = vld [vmem:[%s2618_s5] sm:$0xff]  ;;  %v156_v1 = vld [vmem:[%s2618_s5 + $0x8] sm:$0xff]  ;;  %vm265_vm0 = vcmask 1043456   ;;  %vm303_vm1 = vcmask 1045504   ;;  %vm280_vm2 = vcmask 1046528   ;;  %vm167_vm3 = vcmask 64512  }
  0x41   :  { %v266_v2 = vrot.slane %v155_v0, 4  ;;  %v267_v3 = vrot.slane %v156_v1, 4  ;;  %v159_v4 = vld [vmem:[%s2663_s14] sm:$0xff]  ;;  %2230 = vmatprep.mubr.msk.f32.mxu1 %vm167_vm3, %v155_v0 }
  0x42   :  { %2228 = vmatprep.subr.mxu1 %v159_v4 }
  0x43   :  { %v2809_v5 = vsel %vm265_vm0, %v266_v2, %v267_v3  ;;  %v2812_v6 = vsel %vm265_vm0, 0.0, %v266_v2  ;;  %v307_v7 = vrot.slane %v267_v3, 2  ;;  %v284_v8 = vrot.slane %v267_v3, 1  ;;  %2229 = vmatpush3.msra.mxu1 %v159_v4 }
  0x44   :  { %v304_v9 = vrot.slane %v2812_v6, 2  ;;  %v305_v10 = vrot.slane %v2809_v5, 2  ;;  %v281_v11 = vrot.slane %v2812_v6, 1  ;;  %v282_v12 = vrot.slane %v2809_v5, 1 }
  0x45   :  { %80 = vsyncpa [#allocation3], 0  ;;  %v157_v13 = vld [vmem:[%s2618_s5 + $0x10] sm:$0xff]  ;;  %v390_v14 = vld [vmem:[%s2623_s9] sm:$0xff]  ;;  %2231 = vmatmul.mubr.msk.f32.vlgmr.msra.gmra.mrb[0].mxu1 %vm167_vm3, %v156_v1  ;;  %s2600_s0 = smov 16   ;;  %s2601_s14 = smov 8  }
  0x46   :  { %v391_v15 = vld [vmem:[%s2623_s9 + $0x8] sm:$0xff]  ;;  %v306_v16 = vsel %vm303_vm1, %v304_v9, %v305_v10  ;;  %v283_v17 = vsel %vm280_vm2, %v281_v11, %v282_v12  ;;  %v158_v18 = vld [vmem:[%s2618_s5 + $0x18] sm:$0xff]  ;;  %2233 = vmatprep.mubr.msk.f32.mxu1 %vm167_vm3, %v157_v13  ;;  %v328_v19 = vrot.slane %v2809_v5, 3  ;;  %v330_v20 = vrot.slane %v267_v3, 3  ;;  %v392_v32 = vld [vmem:[%s2623_s9 + $0x10] sm:$0xff]  ;;  %s2602_s5 = smov 24  }
  0x47   :  { %314 = vrot.lane.b32.xlu1 %v306_v16, %s2600_s0  ;;  %291 = vrot.lane.b32.xlu0 %v283_v17, %s2601_s14  ;;  %v308_v21 = vsel %vm303_vm1, %v305_v10, %v307_v7  ;;  %v285_v22 = vsel %vm280_vm2, %v282_v12, %v284_v8  ;;  %v327_v23 = vrot.slane %v2812_v6, 3  ;;  %v2266_v24 = vpack.c.bf16 %v391_v15, %v390_v14  ;;  %v393_v33 = vld [vmem:[%s2623_s9 + $0x18] sm:$0xff]  ;;  %v394_v42 = vld [vmem:[%s2623_s9 + $0x20] sm:$0xff]  ;;  %s2603_s7 = smov 32   ;;  %s2605_s9 = smov 64  }
  0x48   :  { %vm326_vm4 = vcmask 1044480   ;;  %v269_v25 = vrot.slane %v157_v13, 4  ;;  %v270_v26 = vrot.slane %v158_v18, 4  ;;  %v350_v27 = vrot.slane %v2809_v5, 4  ;;  %s3556_s10 = sld [smem:[#allocation18_spill]]  ;;  %s3557_s11 = sld [smem:[#allocation15_spill]] }
  0x49   :  { %2234 = vmatmul.mubr.msk.f32.gmra.mrb[2].mxu1 %vm167_vm3, %v158_v18  ;;  %2267 = vmatprep.subr.bf16.mxu1 %v2266_v24  ;;  %v352_v28 = vrot.slane %v267_v3, 4  ;;  %v331_v29 = vsel %vm326_vm4, %v328_v19, %v330_v20  ;;  %v329_v30 = vsel %vm326_vm4, %v327_v23, %v328_v19  ;;  %v349_v31 = vrot.slane %v2812_v6, 4  ;;  %s3558_s15 = sld [smem:[#allocation16_spill]]  ;;  %s3559_s16 = sld [smem:[#allocation17_spill]] }
  0x4a   :  { %2269 = vmatpush3.bf16.msra.mxu1 %v2266_v24  ;;  %v2843_v34 = vsel %vm265_vm0, %v269_v25, %v270_v26  ;;  %v2846_v35 = vsel %vm265_vm0, 0.0, %v269_v25  ;;  %v2270_v37 = vpack.c.bf16 %v393_v33, %v392_v32  ;;  %v289_v41 = vrot.slane %v270_v26, 1  ;;  %v634_v32 = vld [vmem:[%s2643_s25] sm:$0xff]  ;;  %v635_v33 = vld [vmem:[%s2643_s25 + $0x8] sm:$0xff]  ;;  %s3560_s18 = sld [smem:[#allocation22_spill]]  ;;  %s3561_s22 = sld [smem:[#allocation19_spill]] }
  0x4b   :  { %316 = vrot.lane.b32.xlu1 %v308_v21, %s2600_s0  ;;  %293 = vrot.lane.b32.xlu0 %v285_v22, %s2601_s14  ;;  %v353_v36 = vsel %vm265_vm0, %v350_v27, %v352_v28  ;;  %v351_v38 = vsel %vm265_vm0, %v349_v31, %v350_v27  ;;  %v286_v39 = vrot.slane %v2846_v35, 1  ;;  %v287_v40 = vrot.slane %v2843_v34, 1  ;;  %s3562_s23 = sld [smem:[#allocation20_spill]]  ;;  %s3563_s26 = sld [smem:[#allocation21_spill]] }
  0x4c   :  { %2271 = vmatprep.subr.bf16.mxu1 %v2270_v37  ;;  %v309_v43 = vrot.slane %v2846_v35, 2  ;;  %v310_v46 = vrot.slane %v2843_v34, 2  ;;  %v312_v47 = vrot.slane %v270_v26, 2  ;;  %v332_v48 = vrot.slane %v2846_v35, 3  ;;  %s3564_s28 = sld [smem:[#allocation23_spill]]  ;;  %s3565_s1 = sld [smem:[#allocation24_spill]] }
  0x4d   :  { %v288_v44 = vsel %vm280_vm2, %v286_v39, %v287_v40  ;;  %v290_v45 = vsel %vm280_vm2, %v287_v40, %v289_v41  ;;  %v333_v51 = vrot.slane %v2843_v34, 3  ;;  %v335_v52 = vrot.slane %v270_v26, 3  ;;  %v638_v39 = vld [vmem:[%s2643_s25 + $0x20] sm:$0xff]  ;;  %v639_v40 = vld [vmem:[%s2643_s25 + $0x28] sm:$0xff] }
  0x4e   :  { %2273 = vmatpush3.bf16.msra.mxu1 %v2270_v37  ;;  %v311_v49 = vsel %vm303_vm1, %v309_v43, %v310_v46  ;;  %v313_v50 = vsel %vm303_vm1, %v310_v46, %v312_v47  ;;  %v354_v53 = vrot.slane %v2846_v35, 4  ;;  %v355_v56 = vrot.slane %v2843_v34, 4  ;;  %v637_v37 = vld [vmem:[%s2643_s25 + $0x18] sm:$0xff]  ;;  %v643_v46 = vld [vmem:[%s2643_s25 + $0x48] sm:$0xff] }
  0x4f   :  { %339 = vrot.lane.b32.xlu1 %v331_v29, %s2602_s5  ;;  %337 = vrot.lane.b32.xlu0 %v329_v30, %s2602_s5  ;;  %v334_v54 = vsel %vm326_vm4, %v332_v48, %v333_v51  ;;  %v336_v55 = vsel %vm326_vm4, %v333_v51, %v335_v52  ;;  %v357_v57 = vrot.slane %v270_v26, 4  ;;  %vm375_vm5 = vcmask 130048   ;;  %v641_v43 = vld [vmem:[%s2643_s25 + $0x38] sm:$0xff]  ;;  %v644_v48 = vld [vmem:[%s2643_s25 + $0x50] sm:$0xff] }
  0x50   :  { %2244 = vmatprep.subr.mxu1 %v394_v42  ;;  %v356_v58 = vsel %vm265_vm0, %v354_v53, %v355_v56  ;;  %vm380_vm6 = vcmask 195584   ;;  %vm385_vm7 = vcmask 261120   ;;  %vm402_vm8 = vcmask 326656   ;;  %v646_v51 = vld [vmem:[%s2643_s25 + $0x60] sm:$0xff]  ;;  %v647_v52 = vld [vmem:[%s2643_s25 + $0x68] sm:$0xff] }
  0x51   :  { %v358_v59 = vsel %vm265_vm0, %v355_v56, %v357_v57  ;;  %v2281_v41 = vpack.c.bf16 %v639_v40, %v638_v39  ;;  %v2293_v53 = vpack.c.bf16 %v647_v52, %v646_v51  ;;  %v650_v57 = vld [vmem:[%s2643_s25 + $0x80] sm:$0xff]  ;;  %vm624_vm9 = vcmask 523264  }
  0x52   :  { %2245 = vmatpush3.msra.mxu1 %v394_v42  ;;  %v640_v42 = vld [vmem:[%s2643_s25 + $0x30] sm:$0xff]  ;;  %vm629_vm10 = vcmask 785408   ;;  %vm835_vm11 = vcmask 1041408  }
  0x53   :  { %361 = vrot.lane.b32.xlu1 %v353_v36, %s2603_s7  ;;  %359 = vrot.lane.b32.xlu0 %v351_v38, %s2603_s7  ;;  %v2275_v36 = vpack.c.bf16 %v635_v33, %v634_v32 }
  0x57   :  { %295 = vrot.lane.b32.xlu0 %v288_v44, %s2601_s14  ;;  %297 = vrot.lane.b32.xlu1 %v290_v45, %s2601_s14  ;;  %v2284_v44 = vpack.c.bf16 %v641_v43, %v640_v42  ;;  %v642_v45 = vld [vmem:[%s2643_s25 + $0x40] sm:$0xff] }
  0x58   :  { %v2287_v47 = vpack.c.bf16 %v643_v46, %v642_v45 }
  0x5b   :  { %318 = vrot.lane.b32.xlu0 %v311_v49, %s2600_s0  ;;  %320 = vrot.lane.b32.xlu1 %v313_v50, %s2600_s0  ;;  %v645_v49 = vld [vmem:[%s2643_s25 + $0x58] sm:$0xff] }
  0x5c   :  { %v2290_v50 = vpack.c.bf16 %v645_v49, %v644_v48 }
  0x5f   :  { %341 = vrot.lane.b32.xlu0 %v334_v54, %s2602_s5  ;;  %343 = vrot.lane.b32.xlu1 %v336_v55, %s2602_s5  ;;  %v648_v54 = vld [vmem:[%s2643_s25 + $0x70] sm:$0xff]  ;;  %v649_v55 = vld [vmem:[%s2643_s25 + $0x78] sm:$0xff] }
  0x60   :  { %v2296_v56 = vpack.c.bf16 %v649_v55, %v648_v54 }
  0x63   :  { %363 = vrot.lane.b32.xlu0 %v356_v58, %s2603_s7  ;;  %365 = vrot.lane.b32.xlu1 %v358_v59, %s2603_s7  ;;  %v651_v58 = vld [vmem:[%s2643_s25 + $0x88] sm:$0xff] }
  0x64   :  { %v2299_v59 = vpack.c.bf16 %v651_v58, %v650_v57 }
  0xb9   :  { %v315_v60 = vpop.permute.xlu1 %314  ;;  %v292_v61 = vpop.permute.xlu0 %291 }
  0xba   :  { %v371_v0 = vsel %vm167_vm3, %v2812_v6, %v292_v61 }
  0xbb   :  { %v376_v7 = vsel %vm375_vm5, %v371_v0, %v315_v60  ;;  %v2145_v60 = vld [vmem:[%s2628_s13] ss:$0 sm:$0xff]  ;;  %s2606_s13 = smov 96  }
  0xbc   :  { %v2150_v0 = vld [vmem:[%s2633_s17] ss:$0 sm:$0xff]  ;;  %s3546_s17 = sld [smem:[#allocation5_spill]] }
  0xbd   :  { %v317_v62 = vpop.permute.xlu1 %316  ;;  %v294_v63 = vpop.permute.xlu0 %293 }
  0xbe   :  { %v372_v1 = vsel %vm167_vm3, %v2809_v5, %v294_v63 }
  0xbf   :  { %v377_v4 = vsel %vm375_vm5, %v372_v1, %v317_v62 }
  0xc1   :  { %v340_v2 = vpop.permute.xlu1 %339  ;;  %v338_v3 = vpop.permute.xlu0 %337 }
  0xc2   :  { %v382_v8 = vsel %vm380_vm6, %v377_v4, %v340_v2  ;;  %v381_v9 = vsel %vm380_vm6, %v376_v7, %v338_v3  ;;  %v2151_v3 = vld [vmem:[%s2638_s21] ss:$0 sm:$0xff]  ;;  %v652_v7 = vld [vmem:[%s2643_s25 + $0x90] sm:$0xff]  ;;  %s3547_s21 = sld [smem:[#allocation6_spill]] }
  0xc5   :  { %v362_v10 = vpop.permute.xlu1 %361  ;;  %v360_v11 = vpop.permute.xlu0 %359 }
  0xc6   :  { %v387_v6 = vsel %vm385_vm7, %v382_v8, %v362_v10  ;;  %v386_v5 = vsel %vm385_vm7, %v381_v9, %v360_v11  ;;  %v653_v8 = vld [vmem:[%s2643_s25 + $0x98] sm:$0xff] }
  0xc7   :  { %2246 = vmatprep.mubr.msk.f32.mxu1 %vm402_vm8, %v386_v5  ;;  %v2302_v10 = vpack.c.bf16 %v653_v8, %v652_v7 }
  0xc8   :  { %2247 = vmatmul.mubr.msk.f32.vlgmr.msra.gmra.mrb[4].mxu1 %vm402_vm8, %v387_v6 }
  0xc9   :  { %v296_v12 = vpop.permute.xlu0 %295  ;;  %v298_v13 = vpop.permute.xlu1 %297 }
  0xca   :  { %v373_v14 = vsel %vm167_vm3, %v2846_v35, %v296_v12  ;;  %v374_v15 = vsel %vm167_vm3, %v2843_v34, %v298_v13  ;;  %v636_v34 = vld [vmem:[%s2643_s25 + $0x10] sm:$0xff]  ;;  %v2604_v35 = vmov 0.0|0.0   ;;  %s3548_s25 = sld [smem:[#allocation10_spill]] }
  0xcb   :  { %2274 = vmatprep.subr.bf16.mxu0 %v2604_v35  ;;  %2304 = vmatprep.subr.bf16.mxu1 %v2604_v35  ;;  %v2278_v38 = vpack.c.bf16 %v637_v37, %v636_v34 }
  0xcc   :  { %2276 = vmatpush1.bf16.msra.mxu0 %v2275_v36 }
  0xcd   :  { %v319_v16 = vpop.permute.xlu0 %318  ;;  %v321_v17 = vpop.permute.xlu1 %320  ;;  %2277 = vmatprep.subr.bf16.mxu0 %v2604_v35 }
  0xce   :  { %v378_v18 = vsel %vm375_vm5, %v373_v14, %v319_v16  ;;  %v379_v19 = vsel %vm375_vm5, %v374_v15, %v321_v17 }
  0xd0   :  { %2279 = vmatpush1.bf16.msra.mxu0 %v2278_v38 }
  0xd1   :  { %v342_v20 = vpop.permute.xlu0 %341  ;;  %v344_v21 = vpop.permute.xlu1 %343  ;;  %2280 = vmatprep.subr.bf16.mxu0 %v2604_v35 }
  0xd2   :  { %v383_v22 = vsel %vm380_vm6, %v378_v18, %v342_v20  ;;  %v384_v23 = vsel %vm380_vm6, %v379_v19, %v344_v21 }
  0xd4   :  { %2282 = vmatpush1.bf16.msra.mxu0 %v2281_v41 }
  0xd5   :  { %v364_v24 = vpop.permute.xlu0 %363  ;;  %v366_v25 = vpop.permute.xlu1 %365  ;;  %2283 = vmatprep.subr.bf16.mxu0 %v2604_v35 }
  0xd6   :  { %v388_v26 = vsel %vm385_vm7, %v383_v22, %v364_v24  ;;  %v389_v27 = vsel %vm385_vm7, %v384_v23, %v366_v25 }
  0xd7   :  { %2249 = vmatprep.mubr.msk.f32.mxu1 %vm402_vm8, %v388_v26 }
  0xd8   :  { %2250 = vmatmul.mubr.msk.f32.gmra.mrb[6].mxu1 %vm402_vm8, %v389_v27  ;;  %2285 = vmatpush1.bf16.msra.mxu0 %v2284_v44 }
  0xd9   :  { %2286 = vmatprep.subr.bf16.mxu0 %v2604_v35 }
  0xdc   :  { %2288 = vmatpush1.bf16.msra.mxu0 %v2287_v47 }
  0xdd   :  { %2289 = vmatprep.subr.bf16.mxu0 %v2604_v35 }
  0xe0   :  { %2291 = vmatpush1.bf16.msra.mxu0 %v2290_v50 }
  0xe1   :  { %2292 = vmatprep.subr.bf16.mxu0 %v2604_v35 }
  0xe4   :  { %2294 = vmatpush1.bf16.msra.mxu0 %v2293_v53 }
  0xe5   :  { %2295 = vmatprep.subr.bf16.mxu0 %v2604_v35 }
  0xe8   :  { %2297 = vmatpush1.bf16.msra.mxu0 %v2296_v56 }
  0xe9   :  { %2298 = vmatprep.subr.bf16.mxu0 %v2604_v35 }
  0xec   :  { %2300 = vmatpush1.bf16.msra.mxu0 %v2299_v59 }
  0xed   :  { %2301 = vmatprep.subr.bf16.mxu0 %v2604_v35 }
  0xf0   :  { %2303 = vmatpush1.bf16.msra.mxu0 %v2302_v10 }
  0xf1   :  { %2334 = vmatprep.subr.bf16.mxu0 %v2604_v35 }
 0x118   :  { %v2903_v28 = vpop.f32.mrb[0].mxu1 }
 0x119   :  { %v2905_v29 = vpop.f32.mrb[1].mxu1 }
 0x11c   :  { %v2907_v30 = vpop.f32.mrb[2].mxu1 }
 0x11d   :  { %v2909_v31 = vpop.f32.mrb[3].mxu1 }
 0x19b   :  { %v2248_v61 = vpop.f32.mrb[4].mxu1 }
 0x19c   :  { %v487_v62 = vadd.f32 %v2248_v61, %v2145_v60  ;;  %v481_v63 = vpop.f32.mrb[5].mxu1 }
 0x19d   :  { %v482_v1 = vadd.f32 %v2145_v60, %v481_v63 }
 0x19e   :  { %v501_v2 = vmax.f32 %v487_v62, 0.0 }
 0x19f   :  { %v500_v4 = vmax.f32 %v482_v1, 0.0 }
 0x1a0   :  { %v512_v9 = vmul.f32 %v2150_v0, %v501_v2 }
 0x1a1   :  { %v511_v11 = vmul.f32 %v2150_v0, %v500_v4 }
 0x1a2   :  { %v523_v6 = vadd.f32 %v2151_v3, %v512_v9 }
 0x1a3   :  { %v522_v5 = vadd.f32 %v2151_v3, %v511_v11 }
 0x1a4   :  { %v531_v12 = vrot.slane %v523_v6, 4 }
 0x1a5   :  { %v530_v13 = vrot.slane %v522_v5, 4 }
 0x1a6   :  { %v613_v16 = vrot.slane %v531_v12, 4  ;;  %v547_v37 = vrot.slane %v531_v12, 1  ;;  %v591_v44 = vrot.slane %v531_v12, 3  ;;  %v569_v46 = vrot.slane %v531_v12, 2 }
 0x1a7   :  { %v2947_v14 = vsel %vm265_vm0, %v530_v13, %v531_v12  ;;  %v2950_v15 = vsel %vm265_vm0, 0.0, %v530_v13 }
 0x1a8   :  { %v610_v17 = vrot.slane %v2950_v15, 4  ;;  %v611_v18 = vrot.slane %v2947_v14, 4  ;;  %v566_v19 = vrot.slane %v2950_v15, 2  ;;  %v567_v20 = vrot.slane %v2947_v14, 2 }
 0x1a9   :  { %v544_v21 = vrot.slane %v2950_v15, 1  ;;  %v545_v22 = vrot.slane %v2947_v14, 1  ;;  %v588_v32 = vrot.slane %v2950_v15, 3  ;;  %v589_v33 = vrot.slane %v2947_v14, 3 }
 0x1aa   :  { %v612_v23 = vsel %vm265_vm0, %v610_v17, %v611_v18  ;;  %v568_v24 = vsel %vm303_vm1, %v566_v19, %v567_v20  ;;  %v2961_v25 = vsel %vm265_vm0, %v611_v18, %v613_v16  ;;  %v570_v50 = vsel %vm303_vm1, %v567_v20, %v569_v46  ;;  %v873_v46 = vld [vmem:[%s2673_s24 + $0x20] sm:$0xff] }
 0x1ab   :  { %v2251_v26 = vpop.f32.mrb[6].mxu1  ;;  %2153 = vmatprep.mubr.msk.f32.mxu0 %vm385_vm7, %v612_v23  ;;  %576 = vrot.lane.b32.xlu1 %v568_v24, %s2605_s9  ;;  %v546_v27 = vsel %vm280_vm2, %v544_v21, %v545_v22  ;;  %v548_v40 = vsel %vm280_vm2, %v545_v22, %v547_v37  ;;  %v590_v42 = vsel %vm326_vm4, %v588_v32, %v589_v33 }
 0x1ac   :  { %v497_v34 = vadd.f32 %v2251_v26, %v2145_v60  ;;  %554 = vrot.lane.b32.xlu0 %v546_v27, %s2603_s7  ;;  %v491_v36 = vpop.f32.mrb[7].mxu1  ;;  %v592_v48 = vsel %vm326_vm4, %v589_v33, %v591_v44  ;;  %v872_v44 = vld [vmem:[%s2673_s24 + $0x18] sm:$0xff] }
 0x1ad   :  { %v492_v38 = vadd.f32 %v2145_v60, %v491_v36 }
 0x1ae   :  { %v503_v39 = vmax.f32 %v497_v34, 0.0 }
 0x1af   :  { %v502_v41 = vmax.f32 %v492_v38, 0.0  ;;  %556 = vrot.lane.b32.xlu1 %v548_v40, %s2603_s7  ;;  %v869_v40 = vld [vmem:[%s2673_s24] sm:$0xff] }
 0x1b0   :  { %v514_v43 = vmul.f32 %v2150_v0, %v503_v39  ;;  %598 = vrot.lane.b32.xlu0 %v590_v42, %s2606_s13  ;;  %v871_v42 = vld [vmem:[%s2673_s24 + $0x10] sm:$0xff] }
 0x1b1   :  { %v513_v45 = vmul.f32 %v2150_v0, %v502_v41  ;;  %v870_v41 = vld [vmem:[%s2673_s24 + $0x8] sm:$0xff] }
 0x1b2   :  { %v525_v47 = vadd.f32 %v2151_v3, %v514_v43  ;;  %v2305_v43 = vpack.c.bf16 %v870_v41, %v869_v40 }
 0x1b3   :  { %v524_v49 = vadd.f32 %v2151_v3, %v513_v45  ;;  %600 = vrot.lane.b32.xlu1 %v592_v48, %s2606_s13  ;;  %v2308_v45 = vpack.c.bf16 %v872_v44, %v871_v42 }
 0x1b4   :  { %v534_v51 = vrot.slane %v525_v47, 4  ;;  %578 = vrot.lane.b32.xlu0 %v570_v50, %s2605_s9  ;;  %2306 = vmatpush1.bf16.msra.mxu1 %v2305_v43  ;;  %v874_v47 = vld [vmem:[%s2673_s24 + $0x28] sm:$0xff]  ;;  %v876_v50 = vld [vmem:[%s2673_s24 + $0x38] sm:$0xff] }
 0x1b5   :  { %v533_v52 = vrot.slane %v524_v49, 4  ;;  %2307 = vmatprep.subr.bf16.mxu1 %v2604_v35  ;;  %v2311_v48 = vpack.c.bf16 %v874_v47, %v873_v46  ;;  %v875_v49 = vld [vmem:[%s2673_s24 + $0x30] sm:$0xff] }
 0x1b6   :  { %v552_v55 = vrot.slane %v534_v51, 1  ;;  %v574_v2 = vrot.slane %v534_v51, 2  ;;  %v596_v3 = vrot.slane %v534_v51, 3 }
 0x1b7   :  { %v535_v53 = vsel %vm265_vm0, %v533_v52, %v534_v51  ;;  %v541_v54 = vsel %vm265_vm0, 0.0, %v533_v52  ;;  %v877_v52 = vld [vmem:[%s2673_s24 + $0x40] sm:$0xff] }
 0x1b8   :  { %v571_v56 = vrot.slane %v541_v54, 2  ;;  %v572_v57 = vrot.slane %v535_v53, 2  ;;  %v549_v58 = vrot.slane %v541_v54, 1  ;;  %v550_v59 = vrot.slane %v535_v53, 1  ;;  %2309 = vmatpush1.bf16.msra.mxu1 %v2308_v45 }
 0x1b9   :  { %v593_v60 = vrot.slane %v541_v54, 3  ;;  %v594_v61 = vrot.slane %v535_v53, 3  ;;  %v615_v16 = vrot.slane %v541_v54, 4  ;;  %v616_v17 = vrot.slane %v535_v53, 4  ;;  %2310 = vmatprep.subr.bf16.mxu1 %v2604_v35 }
 0x1ba   :  { %v573_v62 = vsel %vm303_vm1, %v571_v56, %v572_v57  ;;  %v551_v63 = vsel %vm280_vm2, %v549_v58, %v550_v59  ;;  %v553_v0 = vsel %vm280_vm2, %v550_v59, %v552_v55  ;;  %v575_v4 = vsel %vm303_vm1, %v572_v57, %v574_v2  ;;  %v879_v55 = vld [vmem:[%s2673_s24 + $0x50] sm:$0xff]  ;;  %v880_v56 = vld [vmem:[%s2673_s24 + $0x58] sm:$0xff]  ;;  %v881_v58 = vld [vmem:[%s2673_s24 + $0x60] sm:$0xff] }
 0x1bb   :  { %580 = vrot.lane.b32.xlu1 %v573_v62, %s2605_s9  ;;  %558 = vrot.lane.b32.xlu0 %v551_v63, %s2603_s7  ;;  %v595_v1 = vsel %vm326_vm4, %v593_v60, %v594_v61  ;;  %v597_v7 = vsel %vm326_vm4, %v594_v61, %v596_v3  ;;  %v617_v21 = vsel %vm265_vm0, %v615_v16, %v616_v17  ;;  %v882_v59 = vld [vmem:[%s2673_s24 + $0x68] sm:$0xff]  ;;  %v883_v61 = vld [vmem:[%s2673_s24 + $0x70] sm:$0xff] }
 0x1bc   :  { %2312 = vmatpush1.bf16.msra.mxu1 %v2311_v48  ;;  %v2320_v57 = vpack.c.bf16 %v880_v56, %v879_v55  ;;  %v2323_v60 = vpack.c.bf16 %v882_v59, %v881_v58  ;;  %v884_v62 = vld [vmem:[%s2673_s24 + $0x78] sm:$0xff]  ;;  %v2152_v3 = vld [vmem:[%s2648_s29] ss:$0 sm:$0xff]  ;;  %s3549_s29 = sld [smem:[#allocation7_spill]] }
 0x1bd   :  { %2313 = vmatprep.subr.bf16.mxu1 %v2604_v35  ;;  %v2326_v63 = vpack.c.bf16 %v884_v62, %v883_v61 }
 0x1bf   :  { %560 = vrot.lane.b32.xlu1 %v553_v0, %s2603_s7  ;;  %602 = vrot.lane.b32.xlu0 %v595_v1, %s2606_s13  ;;  %v885_v0 = vld [vmem:[%s2673_s24 + $0x80] sm:$0xff]  ;;  %v886_v1 = vld [vmem:[%s2673_s24 + $0x88] sm:$0xff] }
 0x1c0   :  { %v2329_v2 = vpack.c.bf16 %v886_v1, %v885_v0 }
 0x1c3   :  { %582 = vrot.lane.b32.xlu0 %v575_v4, %s2605_s9  ;;  %604 = vrot.lane.b32.xlu1 %v597_v7, %s2606_s13 }
 0x21d   :  { %v577_v8 = vpop.permute.xlu1 %576 }
 0x21e   :  { %v555_v9 = vpop.permute.xlu0 %554 }
 0x21f   :  { %v620_v10 = vsel %vm385_vm7, %v2950_v15, %v555_v9  ;;  %v2157_v9 = vld [vmem:[%s2653_s3] ss:$0 sm:$0xff]  ;;  %s3550_s3 = sld [smem:[#allocation8_spill]] }
 0x220   :  { %v625_v5 = vsel %vm624_vm9, %v620_v10, %v577_v8 }
 0x221   :  { %v557_v11 = vpop.permute.xlu1 %556 }
 0x222   :  { %v599_v6 = vpop.permute.xlu0 %598  ;;  %v621_v18 = vsel %vm385_vm7, %v2947_v14, %v557_v11  ;;  %v887_v11 = vld [vmem:[%s2673_s24 + $0x90] sm:$0xff] }
 0x223   :  { %v630_v12 = vsel %vm629_vm10, %v625_v5, %v599_v6  ;;  %v888_v6 = vld [vmem:[%s2673_s24 + $0x98] sm:$0xff]  ;;  %v2140_v5 = vld [vmem:[%s2668_s19] ss:$0 sm:$0xff]  ;;  %s3552_s19 = sld [smem:[#allocation14_spill]] }
 0x224   :  { %734 = vmatmul.mubr.f32.vlgmr.msra.gmra.mrb[0].mxu0 %v630_v12  ;;  %v2158_v12 = vld [vmem:[%s2658_s8] ss:$0 sm:$0xff]  ;;  %v262_v61 = vadd.f32 %v2907_v30, %v2140_v5  ;;  %s3551_s8 = sld [smem:[#allocation9_spill]] }
 0x225   :  { %2154 = vmatprep.mubr.msk.f32.mxu0 %vm385_vm7, %v2961_v25  ;;  %v601_v13 = vpop.permute.xlu1 %600  ;;  %v618_v25 = vrot.slane %v534_v51, 4  ;;  %v2314_v51 = vpack.c.bf16 %v876_v50, %v875_v49 }
 0x226   :  { %v579_v19 = vpop.permute.xlu0 %578 }
 0x227   :  { %v626_v15 = vsel %vm624_vm9, %v621_v18, %v579_v19  ;;  %v619_v33 = vsel %vm265_vm0, %v616_v17, %v618_v25  ;;  %2315 = vmatpush1.bf16.msra.mxu1 %v2314_v51  ;;  %v2607_v25 = vmov 0.0  }
 0x228   :  { %v631_v20 = vsel %vm629_vm10, %v626_v15, %v601_v13  ;;  %2316 = vmatprep.subr.bf16.mxu1 %v2604_v35  ;;  %v2332_v13 = vpack.c.bf16 %v888_v6, %v887_v11  ;;  %v247_v15 = vadd.f32 %v2140_v5, %v2905_v29 }
 0x229   :  { %739 = vmatmul.mubr.f32.gmra.mrb[2].mxu0 %v631_v20 }
 0x22a   :  { %2155 = vmatprep.mubr.msk.f32.mxu0 %vm385_vm7, %v617_v21 }
 0x22d   :  { %v581_v22 = vpop.permute.xlu1 %580  ;;  %v559_v23 = vpop.permute.xlu0 %558 }
 0x22e   :  { %v622_v24 = vsel %vm385_vm7, %v541_v54, %v559_v23 }
 0x22f   :  { %v627_v27 = vsel %vm624_vm9, %v622_v24, %v581_v22 }
 0x231   :  { %v561_v26 = vpop.permute.xlu1 %560  ;;  %v603_v14 = vpop.permute.xlu0 %602 }
 0x232   :  { %v632_v32 = vsel %vm629_vm10, %v627_v27, %v603_v14  ;;  %v623_v34 = vsel %vm385_vm7, %v535_v53, %v561_v26  ;;  %v878_v53 = vld [vmem:[%s2673_s24 + $0x48] sm:$0xff]  ;;  %v3049_v26 = vrot.slane %v2607_v25, 4  ;;  %v3052_v14 = vrot.slane %v2607_v25, 2  ;;  %s3553_s24 = sld [smem:[#allocation11_spill]] }
 0x233   :  { %744 = vmatmul.mubr.f32.gmra.mrb[4].mxu0 %v632_v32  ;;  %v2317_v54 = vpack.c.bf16 %v878_v53, %v877_v52  ;;  %v252_v27 = vadd.f32 %v2903_v28, %v2140_v5  ;;  %v257_v53 = vadd.f32 %v2140_v5, %v2909_v31 }
 0x234   :  { %2156 = vmatprep.mubr.msk.f32.mxu0 %vm385_vm7, %v619_v33 }
 0x235   :  { %v583_v36 = vpop.permute.xlu0 %582  ;;  %v605_v37 = vpop.permute.xlu1 %604  ;;  %2318 = vmatpush1.bf16.msra.mxu1 %v2317_v54 }
 0x236   :  { %v628_v38 = vsel %vm624_vm9, %v623_v34, %v583_v36  ;;  %2319 = vmatprep.subr.bf16.mxu1 %v2604_v35 }
 0x237   :  { %v633_v39 = vsel %vm629_vm10, %v628_v38, %v605_v37 }
 0x238   :  { %749 = vmatmul.mubr.f32.gmra.mrb[6].mxu0 %v633_v39  ;;  %v3064_v39 = vrot.slane %v2607_v25, 6 }
 0x239   :  { %2321 = vmatpush1.bf16.msra.mxu1 %v2320_v57 }
 0x23a   :  { %2322 = vmatprep.subr.bf16.mxu1 %v2604_v35 }
 0x23d   :  { %2324 = vmatpush1.bf16.msra.mxu1 %v2323_v60 }
 0x23e   :  { %2325 = vmatprep.subr.bf16.mxu1 %v2604_v35 }
 0x241   :  { %2327 = vmatpush1.bf16.msra.mxu1 %v2326_v63 }
 0x242   :  { %2328 = vmatprep.subr.bf16.mxu1 %v2604_v35 }
 0x245   :  { %2330 = vmatpush1.bf16.msra.mxu1 %v2329_v2 }
 0x246   :  { %2331 = vmatprep.subr.bf16.mxu1 %v2604_v35 }
 0x249   :  { %2333 = vmatpush1.bf16.msra.mxu1 %v2332_v13 }
 0x24a   :  { %2364 = vmatprep.subr.bf16.mxu1 %v2604_v35 }
 0x2f7   :  { %v735_v4 = vpop.f32.mrb[0].mxu0 }
 0x2f8   :  { %v736_v7 = vadd.f32 %v2152_v3, %v735_v4  ;;  %v737_v8 = vpop.f32.mrb[1].mxu0 }
 0x2fa   :  { %v754_v10 = vmax.f32 %v736_v7, 0.0 }
 0x2fc   :  { %v765_v16 = vmul.f32 %v2157_v9, %v754_v10  ;;  %v740_v17 = vpop.f32.mrb[2].mxu0 }
 0x2fd   :  { %v741_v18 = vadd.f32 %v2152_v3, %v740_v17  ;;  %v742_v19 = vpop.f32.mrb[3].mxu0 }
 0x2fe   :  { %v776_v20 = vadd.f32 %v2158_v12, %v765_v16 }
 0x2ff   :  { %v755_v21 = vmax.f32 %v741_v18, 0.0 }
 0x300   :  { %v780_v22 = vadd.f32 %v776_v20, %v247_v15 }
 0x301   :  { %v766_v23 = vmul.f32 %v2157_v9, %v755_v21 }
 0x302   :  { %v3046_v24 = vmax.f32 %v780_v22, 0.0 }
 0x303   :  { %v777_v32 = vadd.f32 %v2158_v12, %v766_v23 }
 0x304   :  { %2160 = vmatprep.mubr.msk.f32.mxu1 %vm385_vm7, %v3046_v24  ;;  %v815_v29 = vrot.slane %v3046_v24, 4  ;;  %v794_v33 = vrot.slane %v3046_v24, 2  ;;  %v837_v28 = vrot.slane %v3046_v24, 6 }
 0x305   :  { %v781_v34 = vadd.f32 %v777_v32, %v252_v27 }
 0x306   :  { %v745_v36 = vpop.f32.mrb[4].mxu0  ;;  %v816_v37 = vsel %vm265_vm0, %v3049_v26, %v815_v29  ;;  %v795_v38 = vsel %vm303_vm1, %v3052_v14, %v794_v33  ;;  %v838_v45 = vsel %vm835_vm11, %v3064_v39, %v837_v28 }
 0x307   :  { %v3067_v40 = vmax.f32 %v781_v34, 0.0  ;;  %v746_v41 = vadd.f32 %v2152_v3, %v745_v36  ;;  %823 = vrot.lane.b32.xlu1 %v816_v37, %s2605_s9  ;;  %802 = vrot.lane.b32.xlu0 %v795_v38, %s2603_s7  ;;  %v747_v42 = vpop.f32.mrb[5].mxu0 }
 0x309   :  { %v756_v43 = vmax.f32 %v746_v41, 0.0  ;;  %v796_v44 = vrot.slane %v3067_v40, 2  ;;  %v817_v46 = vrot.slane %v3067_v40, 4  ;;  %v839_v50 = vrot.slane %v3067_v40, 6 }
 0x30b   :  { %v767_v47 = vmul.f32 %v2157_v9, %v756_v43  ;;  %845 = vrot.lane.b32.xlu0 %v838_v45, %s2606_s13  ;;  %v750_v48 = vpop.f32.mrb[6].mxu0  ;;  %v797_v49 = vsel %vm303_vm1, %v794_v33, %v796_v44  ;;  %v818_v56 = vsel %vm265_vm0, %v815_v29, %v817_v46  ;;  %v840_v58 = vsel %vm835_vm11, %v837_v28, %v839_v50  ;;  %v1091_v44 = vld [vmem:[%s2693_s20] sm:$0xff]  ;;  %v1092_v45 = vld [vmem:[%s2693_s20 + $0x8] sm:$0xff]  ;;  %v1093_v46 = vld [vmem:[%s2693_s20 + $0x10] sm:$0xff] }
 0x30c   :  { %v751_v51 = vadd.f32 %v2152_v3, %v750_v48  ;;  %804 = vrot.lane.b32.xlu1 %v797_v49, %s2603_s7  ;;  %v752_v52 = vpop.f32.mrb[7].mxu0  ;;  %v1094_v48 = vld [vmem:[%s2693_s20 + $0x18] sm:$0xff]  ;;  %v1095_v50 = vld [vmem:[%s2693_s20 + $0x20] sm:$0xff] }
 0x30d   :  { %v778_v54 = vadd.f32 %v2158_v12, %v767_v47  ;;  %v2335_v47 = vpack.c.bf16 %v1092_v45, %v1091_v44  ;;  %v2338_v49 = vpack.c.bf16 %v1094_v48, %v1093_v46 }
 0x30e   :  { %v757_v55 = vmax.f32 %v751_v51, 0.0  ;;  %v1096_v51 = vld [vmem:[%s2693_s20 + $0x28] sm:$0xff] }
 0x30f   :  { %v782_v57 = vadd.f32 %v778_v54, %v257_v53  ;;  %825 = vrot.lane.b32.xlu0 %v818_v56, %s2605_s9  ;;  %2336 = vmatpush1.bf16.msra.mxu0 %v2335_v47  ;;  %v2341_v52 = vpack.c.bf16 %v1096_v51, %v1095_v50  ;;  %v1097_v53 = vld [vmem:[%s2693_s20 + $0x30] sm:$0xff]  ;;  %v1098_v54 = vld [vmem:[%s2693_s20 + $0x38] sm:$0xff]  ;;  %v1099_v56 = vld [vmem:[%s2693_s20 + $0x40] sm:$0xff] }
 0x310   :  { %v768_v59 = vmul.f32 %v2157_v9, %v757_v55  ;;  %847 = vrot.lane.b32.xlu1 %v840_v58, %s2606_s13  ;;  %2337 = vmatprep.subr.bf16.mxu0 %v2604_v35  ;;  %v2344_v55 = vpack.c.bf16 %v1098_v54, %v1097_v53 }
 0x311   :  { %v3084_v60 = vmax.f32 %v782_v57, 0.0  ;;  %v1100_v57 = vld [vmem:[%s2693_s20 + $0x48] sm:$0xff] }
 0x312   :  { %v779_v62 = vadd.f32 %v2158_v12, %v768_v59  ;;  %v2347_v58 = vpack.c.bf16 %v1100_v57, %v1099_v56  ;;  %v1101_v59 = vld [vmem:[%s2693_s20 + $0x50] sm:$0xff] }
 0x313   :  { %v819_v63 = vrot.slane %v3084_v60, 4  ;;  %v798_v31 = vrot.slane %v3084_v60, 2  ;;  %v841_v3 = vrot.slane %v3084_v60, 6  ;;  %2339 = vmatpush1.bf16.msra.mxu0 %v2338_v49 }
 0x314   :  { %v783_v0 = vadd.f32 %v779_v62, %v262_v61  ;;  %2340 = vmatprep.subr.bf16.mxu0 %v2604_v35  ;;  %v1102_v61 = vld [vmem:[%s2693_s20 + $0x58] sm:$0xff] }
 0x315   :  { %v820_v1 = vsel %vm265_vm0, %v3049_v26, %v819_v63  ;;  %v799_v2 = vsel %vm303_vm1, %v3052_v14, %v798_v31  ;;  %v842_v7 = vsel %vm835_vm11, %v3064_v39, %v841_v3  ;;  %v2350_v62 = vpack.c.bf16 %v1102_v61, %v1101_v59 }
 0x316   :  { %v3094_v4 = vmax.f32 %v783_v0, 0.0  ;;  %827 = vrot.lane.b32.xlu1 %v820_v1, %s2605_s9  ;;  %806 = vrot.lane.b32.xlu0 %v799_v2, %s2603_s7  ;;  %v1105_v1 = vld [vmem:[%s2693_s20 + $0x70] sm:$0xff]  ;;  %v1106_v2 = vld [vmem:[%s2693_s20 + $0x78] sm:$0xff] }
 0x317   :  { %2342 = vmatpush1.bf16.msra.mxu0 %v2341_v52 }
 0x318   :  { %v800_v30 = vrot.slane %v3094_v4, 2  ;;  %v821_v8 = vrot.slane %v3094_v4, 4  ;;  %v843_v10 = vrot.slane %v3094_v4, 6  ;;  %2343 = vmatprep.subr.bf16.mxu0 %v2604_v35 }
 0x31a   :  { %849 = vrot.lane.b32.xlu0 %v842_v7, %s2606_s13  ;;  %v801_v9 = vsel %vm303_vm1, %v798_v31, %v800_v30  ;;  %v822_v11 = vsel %vm265_vm0, %v819_v63, %v821_v8  ;;  %v844_v6 = vsel %vm835_vm11, %v841_v3, %v843_v10  ;;  %v1103_v63 = vld [vmem:[%s2693_s20 + $0x60] sm:$0xff]  ;;  %v1104_v31 = vld [vmem:[%s2693_s20 + $0x68] sm:$0xff]  ;;  %v2356_v3 = vpack.c.bf16 %v1106_v2, %v1105_v1  ;;  %v1109_v10 = vld [vmem:[%s2693_s20 + $0x90] sm:$0xff] }
 0x31b   :  { %808 = vrot.lane.b32.xlu1 %v801_v9, %s2603_s7  ;;  %2345 = vmatpush1.bf16.msra.mxu0 %v2344_v55  ;;  %v2353_v0 = vpack.c.bf16 %v1104_v31, %v1103_v63  ;;  %v1107_v30 = vld [vmem:[%s2693_s20 + $0x80] sm:$0xff]  ;;  %v1108_v7 = vld [vmem:[%s2693_s20 + $0x88] sm:$0xff] }
 0x31c   :  { %2346 = vmatprep.subr.bf16.mxu0 %v2604_v35  ;;  %v2359_v8 = vpack.c.bf16 %v1108_v7, %v1107_v30  ;;  %v2159_v9 = vld [vmem:[%s2678_s30] ss:$0 sm:$0xff]  ;;  %s3554_s30 = sld [smem:[#allocation12_spill]] }
 0x31e   :  { %829 = vrot.lane.b32.xlu0 %v822_v11, %s2605_s9  ;;  %v1110_v11 = vld [vmem:[%s2693_s20 + $0x98] sm:$0xff]  ;;  %s3555_s20 = sld [smem:[#allocation13_spill]] }
 0x31f   :  { %851 = vrot.lane.b32.xlu1 %v844_v6, %s2606_s13  ;;  %2348 = vmatpush1.bf16.msra.mxu0 %v2347_v58 }
 0x320   :  { %2349 = vmatprep.subr.bf16.mxu0 %v2604_v35 }
 0x323   :  { %2351 = vmatpush1.bf16.msra.mxu0 %v2350_v62 }
 0x324   :  { %2352 = vmatprep.subr.bf16.mxu0 %v2604_v35 }
 0x327   :  { %2354 = vmatpush1.bf16.msra.mxu0 %v2353_v0 }
 0x328   :  { %2355 = vmatprep.subr.bf16.mxu0 %v2604_v35 }
 0x32b   :  { %2357 = vmatpush1.bf16.msra.mxu0 %v2356_v3 }
 0x32c   :  { %2358 = vmatprep.subr.bf16.mxu0 %v2604_v35 }
 0x32f   :  { %2360 = vmatpush1.bf16.msra.mxu0 %v2359_v8 }
 0x330   :  { %2361 = vmatprep.subr.bf16.mxu0 %v2604_v35 }
 0x379   :  { %v824_v5 = vpop.permute.xlu1 %823  ;;  %v803_v12 = vpop.permute.xlu0 %802 }
 0x37a   :  { %v857_v13 = vsel %vm385_vm7, 0.0, %v803_v12 }
 0x37b   :  { %v861_v16 = vsel %vm624_vm9, %v857_v13, %v824_v5  ;;  %v2362_v5 = vpack.c.bf16 %v1110_v11, %v1109_v10 }
 0x37d   :  { %v846_v17 = vpop.permute.xlu0 %845  ;;  %2363 = vmatpush1.bf16.msra.mxu0 %v2362_v5 }
 0x37e   :  { %v865_v18 = vsel %vm629_vm10, %v861_v16, %v846_v17  ;;  %v805_v19 = vpop.permute.xlu1 %804  ;;  %v2164_v16 = vld [vmem:[%s3546_s17] ss:$0 sm:$0xff]  ;;  %2394 = vmatprep.subr.bf16.mxu0 %v2604_v35 }
 0x37f   :  { %969 = vmatmul.mubr.f32.vlgmr.msra.gmra.mrb[8].mxu1 %v865_v18  ;;  %v858_v15 = vsel %vm385_vm7, %v3046_v24, %v805_v19  ;;  %v2165_v18 = vld [vmem:[%s3547_s21] ss:$0 sm:$0xff] }
 0x380   :  { %2161 = vmatprep.mubr.msk.f32.mxu1 %vm385_vm7, %v3067_v40 }
 0x381   :  { %v826_v20 = vpop.permute.xlu0 %825 }
 0x382   :  { %v862_v21 = vsel %vm624_vm9, %v858_v15, %v826_v20  ;;  %v848_v22 = vpop.permute.xlu1 %847 }
 0x383   :  { %v866_v23 = vsel %vm629_vm10, %v862_v21, %v848_v22 }
 0x384   :  { %974 = vmatmul.mubr.f32.gmra.mrb[10].mxu1 %v866_v23 }
 0x385   :  { %2162 = vmatprep.mubr.msk.f32.mxu1 %vm385_vm7, %v3084_v60 }
 0x388   :  { %v828_v27 = vpop.permute.xlu1 %827  ;;  %v807_v32 = vpop.permute.xlu0 %806 }
 0x389   :  { %v859_v29 = vsel %vm385_vm7, 0.0, %v807_v32 }
 0x38a   :  { %v863_v33 = vsel %vm624_vm9, %v859_v29, %v828_v27 }
 0x38c   :  { %v850_v34 = vpop.permute.xlu0 %849 }
 0x38d   :  { %v809_v36 = vpop.permute.xlu1 %808  ;;  %v867_v37 = vsel %vm629_vm10, %v863_v33, %v850_v34 }
 0x38e   :  { %979 = vmatmul.mubr.f32.gmra.mrb[12].mxu1 %v867_v37  ;;  %v860_v38 = vsel %vm385_vm7, %v3084_v60, %v809_v36 }
 0x38f   :  { %2163 = vmatprep.mubr.msk.f32.mxu1 %vm385_vm7, %v3094_v4 }
 0x390   :  { %v830_v28 = vpop.permute.xlu0 %829 }
 0x391   :  { %v864_v41 = vsel %vm624_vm9, %v860_v38, %v830_v28  ;;  %v852_v42 = vpop.permute.xlu1 %851 }
 0x392   :  { %v868_v43 = vsel %vm629_vm10, %v864_v41, %v852_v42 }
 0x393   :  { %984 = vmatmul.mubr.f32.gmra.mrb[14].mxu1 %v868_v43 }
 0x452   :  { %v970_v6 = vpop.f32.mrb[8].mxu1 }
 0x453   :  { %v971_v12 = vadd.f32 %v2159_v9, %v970_v6  ;;  %v972_v13 = vpop.f32.mrb[9].mxu1 }
 0x455   :  { %v989_v17 = vmax.f32 %v971_v12, 0.0 }
 0x457   :  { %v1000_v19 = vmul.f32 %v2164_v16, %v989_v17  ;;  %v975_v15 = vpop.f32.mrb[10].mxu1 }
 0x458   :  { %v976_v20 = vadd.f32 %v2159_v9, %v975_v15  ;;  %v977_v21 = vpop.f32.mrb[11].mxu1 }
 0x459   :  { %v3163_v22 = vadd.f32 %v2165_v18, %v1000_v19 }
 0x45a   :  { %v990_v23 = vmax.f32 %v976_v20, 0.0 }
 0x45b   :  { %2167 = vmatprep.mubr.msk.f32.mxu0 %vm385_vm7, %v3163_v22  ;;  %v1039_v27 = vrot.slane %v3163_v22, 4  ;;  %v1019_v32 = vrot.slane %v3163_v22, 2  ;;  %v1059_v36 = vrot.slane %v3163_v22, 6 }
 0x45c   :  { %v1001_v29 = vmul.f32 %v2164_v16, %v990_v23 }
 0x45d   :  { %v1040_v33 = vsel %vm265_vm0, %v3049_v26, %v1039_v27  ;;  %v1020_v34 = vsel %vm303_vm1, %v3052_v14, %v1019_v32  ;;  %v1060_v28 = vsel %vm835_vm11, %v3064_v39, %v1059_v36 }
 0x45e   :  { %v1012_v37 = vadd.f32 %v2165_v18, %v1001_v29  ;;  %1047 = vrot.lane.b32.xlu1 %v1040_v33, %s2605_s9  ;;  %1027 = vrot.lane.b32.xlu0 %v1020_v34, %s2603_s7 }
 0x460   :  { %v1021_v38 = vrot.slane %v1012_v37, 2  ;;  %v1041_v42 = vrot.slane %v1012_v37, 4  ;;  %v1061_v46 = vrot.slane %v1012_v37, 6 }
 0x461   :  { %v980_v41 = vpop.f32.mrb[12].mxu1 }
 0x462   :  { %1067 = vrot.lane.b32.xlu0 %v1060_v28, %s2606_s13  ;;  %v981_v43 = vadd.f32 %v2159_v9, %v980_v41  ;;  %v1022_v44 = vsel %vm303_vm1, %v1019_v32, %v1021_v38  ;;  %v982_v45 = vpop.f32.mrb[13].mxu1  ;;  %v1042_v48 = vsel %vm265_vm0, %v1039_v27, %v1041_v42  ;;  %v1062_v50 = vsel %vm835_vm11, %v1059_v36, %v1061_v46  ;;  %v1298_v36 = vld [vmem:[%s3548_s25] sm:$0xff]  ;;  %v1300_v38 = vld [vmem:[%s3548_s25 + $0x10] sm:$0xff]  ;;  %v1301_v41 = vld [vmem:[%s3548_s25 + $0x18] sm:$0xff] }
 0x463   :  { %1029 = vrot.lane.b32.xlu1 %v1022_v44, %s2603_s7  ;;  %v2368_v42 = vpack.c.bf16 %v1301_v41, %v1300_v38  ;;  %v1303_v44 = vld [vmem:[%s3548_s25 + $0x28] sm:$0xff]  ;;  %v1304_v46 = vld [vmem:[%s3548_s25 + $0x30] sm:$0xff] }
 0x464   :  { %v991_v47 = vmax.f32 %v981_v43, 0.0  ;;  %v1302_v43 = vld [vmem:[%s3548_s25 + $0x20] sm:$0xff] }
 0x465   :  { %v2371_v45 = vpack.c.bf16 %v1303_v44, %v1302_v43 }
 0x466   :  { %v1002_v49 = vmul.f32 %v2164_v16, %v991_v47  ;;  %1049 = vrot.lane.b32.xlu0 %v1042_v48, %s2605_s9  ;;  %v985_v51 = vpop.f32.mrb[14].mxu1  ;;  %v1305_v47 = vld [vmem:[%s3548_s25 + $0x38] sm:$0xff] }
 0x467   :  { %1069 = vrot.lane.b32.xlu1 %v1062_v50, %s2606_s13  ;;  %v986_v52 = vadd.f32 %v2159_v9, %v985_v51  ;;  %v987_v53 = vpop.f32.mrb[15].mxu1  ;;  %v2374_v48 = vpack.c.bf16 %v1305_v47, %v1304_v46  ;;  %v1307_v50 = vld [vmem:[%s3548_s25 + $0x48] sm:$0xff] }
 0x468   :  { %v1013_v54 = vadd.f32 %v2165_v18, %v1002_v49  ;;  %v1306_v49 = vld [vmem:[%s3548_s25 + $0x40] sm:$0xff]  ;;  %v1309_v53 = vld [vmem:[%s3548_s25 + $0x58] sm:$0xff] }
 0x469   :  { %v992_v55 = vmax.f32 %v986_v52, 0.0  ;;  %v2377_v51 = vpack.c.bf16 %v1307_v50, %v1306_v49  ;;  %v1308_v52 = vld [vmem:[%s3548_s25 + $0x50] sm:$0xff] }
 0x46a   :  { %v1043_v56 = vrot.slane %v1013_v54, 4  ;;  %v1023_v57 = vrot.slane %v1013_v54, 2  ;;  %v1063_v62 = vrot.slane %v1013_v54, 6 }
 0x46b   :  { %v1003_v58 = vmul.f32 %v2164_v16, %v992_v55  ;;  %v1310_v55 = vld [vmem:[%s3548_s25 + $0x60] sm:$0xff] }
 0x46c   :  { %v1044_v59 = vsel %vm265_vm0, %v3049_v26, %v1043_v56  ;;  %v1024_v61 = vsel %vm303_vm1, %v3052_v14, %v1023_v57  ;;  %v1064_v0 = vsel %vm835_vm11, %v3064_v39, %v1063_v62 }
 0x46d   :  { %v1014_v63 = vadd.f32 %v2165_v18, %v1003_v58  ;;  %1051 = vrot.lane.b32.xlu1 %v1044_v59, %s2605_s9  ;;  %1031 = vrot.lane.b32.xlu0 %v1024_v61, %s2603_s7  ;;  %v1312_v58 = vld [vmem:[%s3548_s25 + $0x70] sm:$0xff]  ;;  %v1313_v59 = vld [vmem:[%s3548_s25 + $0x78] sm:$0xff] }
 0x46e   :  { %v2386_v61 = vpack.c.bf16 %v1313_v59, %v1312_v58 }
 0x46f   :  { %v1025_v31 = vrot.slane %v1014_v63, 2  ;;  %v1045_v1 = vrot.slane %v1014_v63, 4  ;;  %v1065_v3 = vrot.slane %v1014_v63, 6 }
 0x471   :  { %1071 = vrot.lane.b32.xlu0 %v1064_v0, %s2606_s13  ;;  %v1026_v2 = vsel %vm303_vm1, %v1023_v57, %v1025_v31  ;;  %v1046_v14 = vsel %vm265_vm0, %v1043_v56, %v1045_v1  ;;  %v1066_v30 = vsel %vm835_vm11, %v1063_v62, %v1065_v3  ;;  %v1311_v56 = vld [vmem:[%s3548_s25 + $0x68] sm:$0xff]  ;;  %v1314_v62 = vld [vmem:[%s3548_s25 + $0x80] sm:$0xff]  ;;  %v1316_v0 = vld [vmem:[%s3548_s25 + $0x90] sm:$0xff] }
 0x472   :  { %1033 = vrot.lane.b32.xlu1 %v1026_v2, %s2603_s7  ;;  %v2383_v57 = vpack.c.bf16 %v1311_v56, %v1310_v55  ;;  %v1317_v1 = vld [vmem:[%s3548_s25 + $0x98] sm:$0xff]  ;;  %v2166_v3 = vld [vmem:[%s3549_s29] ss:$0 sm:$0xff] }
 0x473   :  { %v2392_v2 = vpack.c.bf16 %v1317_v1, %v1316_v0 }
 0x475   :  { %1053 = vrot.lane.b32.xlu0 %v1046_v14, %s2605_s9 }
 0x476   :  { %1073 = vrot.lane.b32.xlu1 %v1066_v30, %s2606_s13 }
 0x479   :  { %1252 = vrot.lane.b32.xlu0 %v3049_v26, %s2603_s7 }
 0x47a   :  { %1261 = vrot.lane.b32.xlu1 %v2607_v25, %s2605_s9 }
 0x4d0   :  { %v1048_v39 = vpop.permute.xlu1 %1047  ;;  %v1028_v7 = vpop.permute.xlu0 %1027 }
 0x4d1   :  { %v1079_v8 = vsel %vm385_vm7, 0.0, %v1028_v7  ;;  %v2171_v7 = vld [vmem:[%s3550_s3] ss:$0 sm:$0xff] }
 0x4d2   :  { %v1083_v9 = vsel %vm624_vm9, %v1079_v8, %v1048_v39 }
 0x4d4   :  { %v1068_v10 = vpop.permute.xlu0 %1067 }
 0x4d5   :  { %v1087_v11 = vsel %vm629_vm10, %v1083_v9, %v1068_v10  ;;  %v1030_v6 = vpop.permute.xlu1 %1029  ;;  %v2172_v9 = vld [vmem:[%s3551_s8] ss:$0 sm:$0xff] }
 0x4d6   :  { %1191 = vmatmul.mubr.f32.vlgmr.msra.gmra.mrb[8].mxu0 %v1087_v11  ;;  %v1080_v5 = vsel %vm385_vm7, %v3163_v22, %v1030_v6 }
 0x4d7   :  { %2168 = vmatprep.mubr.msk.f32.mxu0 %vm385_vm7, %v1012_v37  ;;  %v1299_v37 = vld [vmem:[%s3548_s25 + $0x8] sm:$0xff] }
 0x4d8   :  { %v1050_v12 = vpop.permute.xlu0 %1049  ;;  %v2365_v28 = vpack.c.bf16 %v1299_v37, %v1298_v36 }
 0x4d9   :  { %v1084_v13 = vsel %vm624_vm9, %v1080_v5, %v1050_v12  ;;  %v1070_v16 = vpop.permute.xlu1 %1069 }
 0x4da   :  { %v1088_v17 = vsel %vm629_vm10, %v1084_v13, %v1070_v16  ;;  %2366 = vmatpush1.bf16.msra.mxu1 %v2365_v28 }
 0x4db   :  { %1196 = vmatmul.mubr.f32.gmra.mrb[10].mxu0 %v1088_v17  ;;  %2367 = vmatprep.subr.bf16.mxu1 %v2604_v35 }
 0x4dc   :  { %2169 = vmatprep.mubr.msk.f32.mxu0 %vm385_vm7, %v1013_v54 }
 0x4de   :  { %2369 = vmatpush1.bf16.msra.mxu1 %v2368_v42 }
 0x4df   :  { %v1052_v18 = vpop.permute.xlu1 %1051  ;;  %v1032_v19 = vpop.permute.xlu0 %1031  ;;  %2370 = vmatprep.subr.bf16.mxu1 %v2604_v35 }
 0x4e0   :  { %v1081_v15 = vsel %vm385_vm7, 0.0, %v1032_v19 }
 0x4e1   :  { %v1085_v20 = vsel %vm624_vm9, %v1081_v15, %v1052_v18 }
 0x4e2   :  { %2372 = vmatpush1.bf16.msra.mxu1 %v2371_v45 }
 0x4e3   :  { %v1072_v21 = vpop.permute.xlu0 %1071  ;;  %2373 = vmatprep.subr.bf16.mxu1 %v2604_v35 }
 0x4e4   :  { %v1034_v22 = vpop.permute.xlu1 %1033  ;;  %v1089_v23 = vsel %vm629_vm10, %v1085_v20, %v1072_v21 }
 0x4e5   :  { %1201 = vmatmul.mubr.f32.gmra.mrb[12].mxu0 %v1089_v23  ;;  %v1082_v27 = vsel %vm385_vm7, %v1013_v54, %v1034_v22  ;;  %v2380_v54 = vpack.c.bf16 %v1309_v53, %v1308_v52 }
 0x4e6   :  { %2170 = vmatprep.mubr.msk.f32.mxu0 %vm385_vm7, %v1014_v63  ;;  %2375 = vmatpush1.bf16.msra.mxu1 %v2374_v48  ;;  %v1315_v63 = vld [vmem:[%s3548_s25 + $0x88] sm:$0xff] }
 0x4e7   :  { %v1054_v32 = vpop.permute.xlu0 %1053  ;;  %2376 = vmatprep.subr.bf16.mxu1 %v2604_v35  ;;  %v2389_v31 = vpack.c.bf16 %v1315_v63, %v1314_v62 }
 0x4e8   :  { %v1086_v29 = vsel %vm624_vm9, %v1082_v27, %v1054_v32  ;;  %v1074_v33 = vpop.permute.xlu1 %1073 }
 0x4e9   :  { %v1090_v34 = vsel %vm629_vm10, %v1086_v29, %v1074_v33 }
 0x4ea   :  { %1206 = vmatmul.mubr.f32.gmra.mrb[14].mxu0 %v1090_v34  ;;  %2378 = vmatpush1.bf16.msra.mxu1 %v2377_v51 }
 0x4eb   :  { %2379 = vmatprep.subr.bf16.mxu1 %v2604_v35 }
 0x4ec   :  { %v3287_v50 = vpop.permute.xlu1 %1261 }
 0x4ee   :  { %2381 = vmatpush1.bf16.msra.mxu1 %v2380_v54 }
 0x4ef   :  { %2382 = vmatprep.subr.bf16.mxu1 %v2604_v35 }
 0x4f2   :  { %2384 = vmatpush1.bf16.msra.mxu1 %v2383_v57 }
 0x4f3   :  { %2385 = vmatprep.subr.bf16.mxu1 %v2604_v35 }
 0x4f6   :  { %2387 = vmatpush1.bf16.msra.mxu1 %v2386_v61 }
 0x4f7   :  { %2388 = vmatprep.subr.bf16.mxu1 %v2604_v35 }
 0x4fa   :  { %2390 = vmatpush1.bf16.msra.mxu1 %v2389_v31 }
 0x4fb   :  { %2391 = vmatprep.subr.bf16.mxu1 %v2604_v35 }
 0x4fe   :  { %2393 = vmatpush1.bf16.msra.mxu1 %v2392_v2 }
 0x4ff   :  { %2424 = vmatprep.subr.bf16.mxu1 %v2604_v35 }
 0x5a9   :  { %v1192_v14 = vpop.f32.mrb[8].mxu0 }
 0x5aa   :  { %v1193_v30 = vadd.f32 %v2166_v3, %v1192_v14  ;;  %v1194_v39 = vpop.f32.mrb[9].mxu0 }
 0x5ab   :  { %v1489_v39 = vld [vmem:[%s3552_s19 + $0x8] sm:$0xff] }
 0x5ac   :  { %v1211_v8 = vmax.f32 %v1193_v30, 0.0  ;;  %v1488_v30 = vld [vmem:[%s3552_s19] sm:$0xff] }
 0x5ae   :  { %v1222_v10 = vmul.f32 %v2171_v7, %v1211_v8  ;;  %v1197_v11 = vpop.f32.mrb[10].mxu0  ;;  %v2395_v8 = vpack.c.bf16 %v1489_v39, %v1488_v30 }
 0x5af   :  { %v1198_v6 = vadd.f32 %v2166_v3, %v1197_v11  ;;  %v1199_v5 = vpop.f32.mrb[11].mxu0  ;;  %v1492_v11 = vld [vmem:[%s3552_s19 + $0x20] sm:$0xff] }
 0x5b0   :  { %v1233_v12 = vadd.f32 %v2172_v9, %v1222_v10  ;;  %2396 = vmatpush1.bf16.msra.mxu0 %v2395_v8 }
 0x5b1   :  { %v1212_v13 = vmax.f32 %v1198_v6, 0.0  ;;  %2397 = vmatprep.subr.bf16.mxu0 %v2604_v35  ;;  %v1493_v6 = vld [vmem:[%s3552_s19 + $0x28] sm:$0xff] }
 0x5b2   :  { %v1237_v16 = vadd.f32 %v1233_v12, %v3046_v24  ;;  %v2401_v5 = vpack.c.bf16 %v1493_v6, %v1492_v11  ;;  %v1494_v12 = vld [vmem:[%s3552_s19 + $0x30] sm:$0xff]  ;;  %v1662_v11 = vld [vmem:[%s3556_s10 + $0x8] sm:$0xff] }
 0x5b3   :  { %v1223_v17 = vmul.f32 %v2171_v7, %v1212_v13  ;;  %v1495_v13 = vld [vmem:[%s3552_s19 + $0x38] sm:$0xff] }
 0x5b4   :  { %v3254_v18 = vmax.f32 %v1237_v16, 0.0  ;;  %v2404_v16 = vpack.c.bf16 %v1495_v13, %v1494_v12  ;;  %v1663_v12 = vld [vmem:[%s3556_s10 + $0x10] sm:$0xff]  ;;  %v1664_v13 = vld [vmem:[%s3556_s10 + $0x18] sm:$0xff] }
 0x5b5   :  { %v1234_v19 = vadd.f32 %v2172_v9, %v1223_v17  ;;  %v1496_v17 = vld [vmem:[%s3552_s19 + $0x40] sm:$0xff] }
 0x5b6   :  { %2174 = vmatprep.mubr.msk.f32.mxu1 %vm385_vm7, %v3254_v18  ;;  %v1248_v15 = vrot.slane %v3254_v18, 4 }
 0x5b7   :  { %v1238_v20 = vadd.f32 %v1234_v19, %v3067_v40  ;;  %v1497_v19 = vld [vmem:[%s3552_s19 + $0x48] sm:$0xff] }
 0x5b8   :  { %v1249_v21 = vsel %vm265_vm0, %v3049_v26, %v1248_v15  ;;  %v1202_v22 = vpop.f32.mrb[12].mxu0 }
 0x5b9   :  { %v3262_v23 = vmax.f32 %v1238_v20, 0.0  ;;  %1254 = vrot.lane.b32.xlu1 %v1249_v21, %s2603_s7  ;;  %1276 = vrot.lane.b32.xlu0 %v1249_v21, %s2606_s13  ;;  %v1203_v24 = vadd.f32 %v2166_v3, %v1202_v22  ;;  %v1204_v27 = vpop.f32.mrb[13].mxu0  ;;  %v1498_v20 = vld [vmem:[%s3552_s19 + $0x50] sm:$0xff]  ;;  %v1499_v21 = vld [vmem:[%s3552_s19 + $0x58] sm:$0xff] }
 0x5ba   :  { %v2410_v22 = vpack.c.bf16 %v1499_v21, %v1498_v20  ;;  %v1501_v27 = vld [vmem:[%s3552_s19 + $0x68] sm:$0xff]  ;;  %v1665_v20 = vld [vmem:[%s3556_s10 + $0x20] sm:$0xff] }
 0x5bb   :  { %v1213_v32 = vmax.f32 %v1203_v24, 0.0  ;;  %v1272_v29 = vrot.slane %v3262_v23, 4  ;;  %v1500_v24 = vld [vmem:[%s3552_s19 + $0x60] sm:$0xff]  ;;  %v1666_v21 = vld [vmem:[%s3556_s10 + $0x28] sm:$0xff] }
 0x5bd   :  { %v1224_v33 = vmul.f32 %v2171_v7, %v1213_v32  ;;  %1263 = vrot.lane.b32.xlu0 %v3254_v18, %s2605_s9  ;;  %v1273_v40 = vsel %vm265_vm0, %v1248_v15, %v1272_v29  ;;  %v1207_v34 = vpop.f32.mrb[14].mxu0  ;;  %v2407_v15 = vpack.c.bf16 %v1497_v19, %v1496_v17  ;;  %v2413_v32 = vpack.c.bf16 %v1501_v27, %v1500_v24  ;;  %v1502_v29 = vld [vmem:[%s3552_s19 + $0x70] sm:$0xff]  ;;  %v1668_v27 = vld [vmem:[%s3556_s10 + $0x38] sm:$0xff] }
 0x5be   :  { %1278 = vrot.lane.b32.xlu1 %v1273_v40, %s2606_s13  ;;  %v1208_v36 = vadd.f32 %v2166_v3, %v1207_v34  ;;  %v1209_v37 = vpop.f32.mrb[15].mxu0  ;;  %v1504_v34 = vld [vmem:[%s3552_s19 + $0x80] sm:$0xff]  ;;  %v2428_v19 = vpack.c.bf16 %v1664_v13, %v1663_v12  ;;  %v1667_v24 = vld [vmem:[%s3556_s10 + $0x30] sm:$0xff] }
 0x5bf   :  { %v1235_v38 = vadd.f32 %v2172_v9, %v1224_v33  ;;  %v1503_v33 = vld [vmem:[%s3552_s19 + $0x78] sm:$0xff] }
 0x5c0   :  { %v1214_v28 = vmax.f32 %v1208_v36, 0.0  ;;  %v2416_v40 = vpack.c.bf16 %v1503_v33, %v1502_v29  ;;  %v1505_v36 = vld [vmem:[%s3552_s19 + $0x88] sm:$0xff]  ;;  %v1669_v29 = vld [vmem:[%s3556_s10 + $0x40] sm:$0xff] }
 0x5c1   :  { %v1239_v41 = vadd.f32 %v1235_v38, %v3084_v60  ;;  %v2419_v37 = vpack.c.bf16 %v1505_v36, %v1504_v34  ;;  %v1506_v38 = vld [vmem:[%s3552_s19 + $0x90] sm:$0xff]  ;;  %v1670_v33 = vld [vmem:[%s3556_s10 + $0x48] sm:$0xff]  ;;  %v1672_v36 = vld [vmem:[%s3556_s10 + $0x58] sm:$0xff] }
 0x5c2   :  { %v1225_v42 = vmul.f32 %v2171_v7, %v1214_v28  ;;  %v1490_v7 = vld [vmem:[%s3552_s19 + $0x10] sm:$0xff]  ;;  %v1507_v28 = vld [vmem:[%s3552_s19 + $0x98] sm:$0xff] }
 0x5c3   :  { %v3272_v43 = vmax.f32 %v1239_v41, 0.0  ;;  %v2422_v41 = vpack.c.bf16 %v1507_v28, %v1506_v38  ;;  %v1671_v34 = vld [vmem:[%s3556_s10 + $0x50] sm:$0xff]  ;;  %v1673_v38 = vld [vmem:[%s3556_s10 + $0x60] sm:$0xff]  ;;  %v1674_v28 = vld [vmem:[%s3556_s10 + $0x68] sm:$0xff] }
 0x5c4   :  { %v1236_v44 = vadd.f32 %v2172_v9, %v1225_v42  ;;  %v1491_v9 = vld [vmem:[%s3552_s19 + $0x18] sm:$0xff]  ;;  %v2173_v42 = vld [vmem:[%s3553_s24] ss:$0 sm:$0xff] }
 0x5c5   :  { %v1250_v45 = vrot.slane %v3272_v43, 4  ;;  %v2398_v10 = vpack.c.bf16 %v1491_v9, %v1490_v7 }
 0x5c6   :  { %v1240_v46 = vadd.f32 %v1236_v44, %v3094_v4  ;;  %v1253_v4 = vpop.permute.xlu0 %1252 }
 0x5c7   :  { %v1251_v47 = vsel %vm265_vm0, %v3049_v26, %v1250_v45  ;;  %v1288_v51 = vsel %vm385_vm7, 0.0, %v1253_v4  ;;  %2399 = vmatpush1.bf16.msra.mxu0 %v2398_v10  ;;  %v1661_v10 = vld [vmem:[%s3556_s10] sm:$0xff] }
 0x5c8   :  { %v3278_v48 = vmax.f32 %v1240_v46, 0.0  ;;  %1256 = vrot.lane.b32.xlu1 %v1251_v47, %s2603_s7  ;;  %1280 = vrot.lane.b32.xlu0 %v1251_v47, %s2606_s13  ;;  %v3292_v52 = vsel %vm624_vm9, %v1288_v51, %v3287_v50  ;;  %v2178_v47 = vld [vmem:[%s3554_s30] ss:$0 sm:$0xff] }
 0x5c9   :  { %2400 = vmatprep.subr.bf16.mxu0 %v2604_v35 }
 0x5ca   :  { %v1274_v49 = vrot.slane %v3278_v48, 4 }
 0x5cb   :  { %2402 = vmatpush1.bf16.msra.mxu0 %v2401_v5  ;;  %v2425_v5 = vpack.c.bf16 %v1662_v11, %v1661_v10  ;;  %v2186_v10 = vld [vmem:[%s3559_s16] ss:$0 sm:$0xff] }
 0x5cc   :  { %1265 = vrot.lane.b32.xlu0 %v3272_v43, %s2605_s9  ;;  %v1275_v60 = vsel %vm265_vm0, %v1250_v45, %v1274_v49  ;;  %2403 = vmatprep.subr.bf16.mxu0 %v2604_v35 }
 0x5cd   :  { %1282 = vrot.lane.b32.xlu1 %v1275_v60, %s2606_s13  ;;  %v2179_v60 = vld [vmem:[%s3555_s20] ss:$0 sm:$0xff] }
 0x5cf   :  { %2405 = vmatpush1.bf16.msra.mxu0 %v2404_v16 }
 0x5d0   :  { %2406 = vmatprep.subr.bf16.mxu0 %v2604_v35 }
 0x5d3   :  { %2408 = vmatpush1.bf16.msra.mxu0 %v2407_v15 }
 0x5d4   :  { %2409 = vmatprep.subr.bf16.mxu0 %v2604_v35 }
 0x5d7   :  { %2411 = vmatpush1.bf16.msra.mxu0 %v2410_v22  ;;  %v2431_v22 = vpack.c.bf16 %v1666_v21, %v1665_v20 }
 0x5d8   :  { %2412 = vmatprep.subr.bf16.mxu0 %v2604_v35 }
 0x5db   :  { %2414 = vmatpush1.bf16.msra.mxu0 %v2413_v32  ;;  %v2434_v32 = vpack.c.bf16 %v1668_v27, %v1667_v24 }
 0x5dc   :  { %2415 = vmatprep.subr.bf16.mxu0 %v2604_v35 }
 0x5df   :  { %2417 = vmatpush1.bf16.msra.mxu0 %v2416_v40  ;;  %v2437_v40 = vpack.c.bf16 %v1670_v33, %v1669_v29  ;;  %v1819_v33 = vld [vmem:[%s3560_s18] sm:$0xff] }
 0x5e0   :  { %2418 = vmatprep.subr.bf16.mxu0 %v2604_v35 }
 0x5e3   :  { %2420 = vmatpush1.bf16.msra.mxu0 %v2419_v37  ;;  %v2440_v37 = vpack.c.bf16 %v1672_v36, %v1671_v34  ;;  %v1821_v34 = vld [vmem:[%s3560_s18 + $0x10] sm:$0xff] }
 0x5e4   :  { %2421 = vmatprep.subr.bf16.mxu0 %v2604_v35 }
 0x5e7   :  { %2423 = vmatpush1.bf16.msra.mxu0 %v2422_v41 }
 0x5e8   :  { %2454 = vmatprep.subr.bf16.mxu0 %v2604_v35 }
 0x62b   :  { %v1255_v53 = vpop.permute.xlu1 %1254  ;;  %v1277_v54 = vpop.permute.xlu0 %1276 }
 0x62c   :  { %v1294_v55 = vsel %vm629_vm10, %v3292_v52, %v1277_v54  ;;  %v1289_v56 = vsel %vm385_vm7, 0.0, %v1255_v53 }
 0x62d   :  { %1398 = vmatmul.mubr.f32.vlgmr.msra.gmra.mrb[16].mxu1 %v1294_v55 }
 0x62e   :  { %2175 = vmatprep.mubr.msk.f32.mxu1 %vm385_vm7, %v3262_v23  ;;  %2426 = vmatpush1.bf16.msra.mxu1 %v2425_v5 }
 0x62f   :  { %v1264_v57 = vpop.permute.xlu0 %1263  ;;  %2427 = vmatprep.subr.bf16.mxu1 %v2604_v35 }
 0x630   :  { %v1292_v58 = vsel %vm624_vm9, %v1289_v56, %v1264_v57  ;;  %v1279_v59 = vpop.permute.xlu1 %1278 }
 0x631   :  { %v1295_v61 = vsel %vm629_vm10, %v1292_v58, %v1279_v59 }
 0x632   :  { %1403 = vmatmul.mubr.f32.gmra.mrb[18].mxu1 %v1295_v61 }
 0x633   :  { %2176 = vmatprep.mubr.msk.f32.mxu1 %vm385_vm7, %v3272_v43  ;;  %2429 = vmatpush1.bf16.msra.mxu1 %v2428_v19 }
 0x634   :  { %2430 = vmatprep.subr.bf16.mxu1 %v2604_v35 }
 0x637   :  { %2432 = vmatpush1.bf16.msra.mxu1 %v2431_v22 }
 0x638   :  { %2433 = vmatprep.subr.bf16.mxu1 %v2604_v35 }
 0x63a   :  { %v1257_v62 = vpop.permute.xlu1 %1256  ;;  %v1281_v63 = vpop.permute.xlu0 %1280 }
 0x63b   :  { %v1296_v31 = vsel %vm629_vm10, %v3292_v52, %v1281_v63  ;;  %v1290_v0 = vsel %vm385_vm7, 0.0, %v1257_v62  ;;  %2435 = vmatpush1.bf16.msra.mxu1 %v2434_v32 }
 0x63c   :  { %1408 = vmatmul.mubr.f32.gmra.mrb[20].mxu1 %v1296_v31  ;;  %2436 = vmatprep.subr.bf16.mxu1 %v2604_v35 }
 0x63d   :  { %2177 = vmatprep.mubr.msk.f32.mxu1 %vm385_vm7, %v3278_v48 }
 0x63e   :  { %v1266_v1 = vpop.permute.xlu0 %1265 }
 0x63f   :  { %v1293_v2 = vsel %vm624_vm9, %v1290_v0, %v1266_v1  ;;  %v1283_v3 = vpop.permute.xlu1 %1282  ;;  %2438 = vmatpush1.bf16.msra.mxu1 %v2437_v40  ;;  %v1820_v40 = vld [vmem:[%s3560_s18 + $0x8] sm:$0xff] }
 0x640   :  { %v1297_v14 = vsel %vm629_vm10, %v1293_v2, %v1283_v3  ;;  %2439 = vmatprep.subr.bf16.mxu1 %v2604_v35  ;;  %v2455_v36 = vpack.c.bf16 %v1820_v40, %v1819_v33 }
 0x641   :  { %1413 = vmatmul.mubr.f32.gmra.mrb[22].mxu1 %v1297_v14 }
 0x643   :  { %2441 = vmatpush1.bf16.msra.mxu1 %v2440_v37  ;;  %v1822_v37 = vld [vmem:[%s3560_s18 + $0x18] sm:$0xff] }
 0x644   :  { %2442 = vmatprep.subr.bf16.mxu1 %v2604_v35 }
 0x700   :  { %v1399_v44 = vpop.f32.mrb[16].mxu1 }
 0x701   :  { %v1400_v45 = vadd.f32 %v2173_v42, %v1399_v44  ;;  %v1401_v46 = vpop.f32.mrb[17].mxu1 }
 0x703   :  { %v1418_v49 = vmax.f32 %v1400_v45, 0.0 }
 0x705   :  { %v1429_v4 = vmul.f32 %v2178_v47, %v1418_v49  ;;  %v1404_v51 = vpop.f32.mrb[18].mxu1 }
 0x706   :  { %v1405_v53 = vadd.f32 %v2173_v42, %v1404_v51  ;;  %v1406_v54 = vpop.f32.mrb[19].mxu1 }
 0x707   :  { %v1440_v55 = vadd.f32 %v2179_v60, %v1429_v4 }
 0x708   :  { %v1419_v56 = vmax.f32 %v1405_v53, 0.0 }
 0x709   :  { %2181 = vmatprep.mubr.msk.f32.mxu0 %vm385_vm7, %v1440_v55  ;;  %v1446_v57 = vrot.slane %v1440_v55, 4 }
 0x70a   :  { %v1430_v58 = vmul.f32 %v2178_v47, %v1419_v56 }
 0x70b   :  { %v1447_v59 = vsel %vm265_vm0, %v3049_v26, %v1446_v57 }
 0x70c   :  { %v3346_v61 = vadd.f32 %v2179_v60, %v1430_v58  ;;  %1450 = vrot.lane.b32.xlu1 %v1447_v59, %s2603_s7  ;;  %1468 = vrot.lane.b32.xlu0 %v1447_v59, %s2606_s13  ;;  %v1675_v59 = vld [vmem:[%s3556_s10 + $0x70] sm:$0xff] }
 0x70e   :  { %v1464_v62 = vrot.slane %v3346_v61, 4 }
 0x70f   :  { %v1409_v63 = vpop.f32.mrb[20].mxu1 }
 0x710   :  { %1456 = vrot.lane.b32.xlu0 %v1440_v55, %s2605_s9  ;;  %v1410_v31 = vadd.f32 %v2173_v42, %v1409_v63  ;;  %v1465_v0 = vsel %vm265_vm0, %v1446_v57, %v1464_v62  ;;  %v1411_v1 = vpop.f32.mrb[21].mxu1  ;;  %v1678_v63 = vld [vmem:[%s3556_s10 + $0x88] sm:$0xff] }
 0x711   :  { %1470 = vrot.lane.b32.xlu1 %v1465_v0, %s2606_s13  ;;  %v1679_v0 = vld [vmem:[%s3556_s10 + $0x90] sm:$0xff]  ;;  %v1680_v1 = vld [vmem:[%s3556_s10 + $0x98] sm:$0xff] }
 0x712   :  { %v1420_v2 = vmax.f32 %v1410_v31, 0.0 }
 0x714   :  { %v1431_v3 = vmul.f32 %v2178_v47, %v1420_v2  ;;  %v1414_v14 = vpop.f32.mrb[22].mxu1  ;;  %v2452_v2 = vpack.c.bf16 %v1680_v1, %v1679_v0  ;;  %v1833_v0 = vld [vmem:[%s3560_s18 + $0x70] sm:$0xff]  ;;  %v1834_v1 = vld [vmem:[%s3560_s18 + $0x78] sm:$0xff] }
 0x715   :  { %v1415_v30 = vadd.f32 %v2173_v42, %v1414_v14  ;;  %v1416_v39 = vpop.f32.mrb[23].mxu1 }
 0x716   :  { %v1442_v7 = vadd.f32 %v2179_v60, %v1431_v3  ;;  %v2180_v3 = vld [vmem:[%s3557_s11] ss:$0 sm:$0xff] }
 0x717   :  { %v1421_v8 = vmax.f32 %v1415_v30, 0.0 }
 0x718   :  { %v1448_v9 = vrot.slane %v1442_v7, 4 }
 0x719   :  { %v1432_v6 = vmul.f32 %v2178_v47, %v1421_v8 }
 0x71a   :  { %v1449_v16 = vsel %vm265_vm0, %v3049_v26, %v1448_v9 }
 0x71b   :  { %v1443_v17 = vadd.f32 %v2179_v60, %v1432_v6  ;;  %1452 = vrot.lane.b32.xlu1 %v1449_v16, %s2603_s7  ;;  %1472 = vrot.lane.b32.xlu0 %v1449_v16, %s2606_s13 }
 0x71d   :  { %v1466_v15 = vrot.slane %v1443_v17, 4 }
 0x71f   :  { %1458 = vrot.lane.b32.xlu0 %v1442_v7, %s2605_s9  ;;  %v1467_v26 = vsel %vm265_vm0, %v1448_v9, %v1466_v15 }
 0x720   :  { %1474 = vrot.lane.b32.xlu1 %v1467_v26, %s2606_s13 }
 0x723   :  { %1642 = vrot.lane.b32.xlu0 %v2607_v25, %s2603_s7 }
 0x724   :  { %1647 = vrot.lane.b32.xlu1 %v2607_v25, %s2606_s13  ;;  %v2443_v25 = vpack.c.bf16 %v1674_v28, %v1673_v38 }
 0x726   :  { %2444 = vmatpush1.bf16.msra.mxu1 %v2443_v25 }
 0x727   :  { %2445 = vmatprep.subr.bf16.mxu1 %v2604_v35 }
 0x77e   :  { %v1451_v41 = vpop.permute.xlu1 %1450  ;;  %v1469_v42 = vpop.permute.xlu0 %1468 }
 0x77f   :  { %v1484_v44 = vsel %vm629_vm10, %v3292_v52, %v1469_v42  ;;  %v1480_v45 = vsel %vm385_vm7, 0.0, %v1451_v41  ;;  %v1823_v41 = vld [vmem:[%s3560_s18 + $0x20] sm:$0xff]  ;;  %v1824_v42 = vld [vmem:[%s3560_s18 + $0x28] sm:$0xff] }
 0x780   :  { %1588 = vmatmul.mubr.f32.vlgmr.msra.gmra.mrb[16].mxu0 %v1484_v44 }
 0x781   :  { %2182 = vmatprep.mubr.msk.f32.mxu0 %vm385_vm7, %v3346_v61  ;;  %v1676_v61 = vld [vmem:[%s3556_s10 + $0x78] sm:$0xff]  ;;  %2456 = vmatpush1.bf16.msra.mxu0 %v2455_v36 }
 0x782   :  { %v1457_v46 = vpop.permute.xlu0 %1456  ;;  %v2446_v62 = vpack.c.bf16 %v1676_v61, %v1675_v59  ;;  %2457 = vmatprep.subr.bf16.mxu0 %v2604_v35  ;;  %v1829_v59 = vld [vmem:[%s3560_s18 + $0x50] sm:$0xff]  ;;  %v1830_v61 = vld [vmem:[%s3560_s18 + $0x58] sm:$0xff] }
 0x783   :  { %v1482_v47 = vsel %vm624_vm9, %v1480_v45, %v1457_v46  ;;  %v1471_v49 = vpop.permute.xlu1 %1470 }
 0x784   :  { %v1485_v60 = vsel %vm629_vm10, %v1482_v47, %v1471_v49  ;;  %2447 = vmatpush1.bf16.msra.mxu1 %v2446_v62  ;;  %v2461_v49 = vpack.c.bf16 %v1824_v42, %v1823_v41  ;;  %v2470_v62 = vpack.c.bf16 %v1830_v61, %v1829_v59  ;;  %v2199_v61 = vld [vmem:[%s3565_s1] ss:$0 sm:$0xff] }
 0x785   :  { %1593 = vmatmul.mubr.f32.gmra.mrb[18].mxu0 %v1485_v60  ;;  %2448 = vmatprep.subr.bf16.mxu1 %v2604_v35 }
 0x786   :  { %2183 = vmatprep.mubr.msk.f32.mxu0 %vm385_vm7, %v1442_v7  ;;  %v2185_v7 = vld [vmem:[%s3558_s15] ss:$0 sm:$0xff] }
 0x78d   :  { %v1453_v4 = vpop.permute.xlu1 %1452  ;;  %v1473_v51 = vpop.permute.xlu0 %1472 }
 0x78e   :  { %v1486_v53 = vsel %vm629_vm10, %v3292_v52, %v1473_v51  ;;  %v1481_v54 = vsel %vm385_vm7, 0.0, %v1453_v4  ;;  %v1677_v52 = vld [vmem:[%s3556_s10 + $0x80] sm:$0xff]  ;;  %v1825_v4 = vld [vmem:[%s3560_s18 + $0x30] sm:$0xff]  ;;  %v1826_v51 = vld [vmem:[%s3560_s18 + $0x38] sm:$0xff] }
 0x78f   :  { %1598 = vmatmul.mubr.f32.gmra.mrb[20].mxu0 %v1486_v53  ;;  %v2449_v31 = vpack.c.bf16 %v1678_v63, %v1677_v52  ;;  %v1831_v52 = vld [vmem:[%s3560_s18 + $0x60] sm:$0xff]  ;;  %v1832_v63 = vld [vmem:[%s3560_s18 + $0x68] sm:$0xff] }
 0x790   :  { %2184 = vmatprep.mubr.msk.f32.mxu0 %vm385_vm7, %v1443_v17 }
 0x791   :  { %v1459_v55 = vpop.permute.xlu0 %1458  ;;  %2450 = vmatpush1.bf16.msra.mxu1 %v2449_v31  ;;  %v2473_v31 = vpack.c.bf16 %v1832_v63, %v1831_v52  ;;  %v2200_v52 = vld [vmem:[%s2788_s12] ss:$0 sm:$0xff] }
 0x792   :  { %v1483_v56 = vsel %vm624_vm9, %v1481_v54, %v1459_v55  ;;  %v1475_v57 = vpop.permute.xlu1 %1474  ;;  %2451 = vmatprep.subr.bf16.mxu1 %v2604_v35 }
 0x793   :  { %v1487_v58 = vsel %vm629_vm10, %v1483_v56, %v1475_v57  ;;  %v2464_v56 = vpack.c.bf16 %v1826_v51, %v1825_v4  ;;  %v1828_v57 = vld [vmem:[%s3560_s18 + $0x48] sm:$0xff]  ;;  %v1975_v4 = vld [vmem:[%s2793_s6] sm:$0xff] }
 0x794   :  { %1603 = vmatmul.mubr.f32.gmra.mrb[22].mxu0 %v1487_v58  ;;  %v1976_v51 = vld [vmem:[%s2793_s6 + $0x8] sm:$0xff] }
 0x795   :  { %2453 = vmatpush1.bf16.msra.mxu1 %v2452_v2  ;;  %v1643_v9 = vpop.permute.xlu0 %1642  ;;  %v2476_v2 = vpack.c.bf16 %v1834_v1, %v1833_v0 }
 0x796   :  { %v1656_v13 = vsel %vm385_vm7, 0.0, %v1643_v9  ;;  %v1648_v20 = vpop.permute.xlu1 %1647 }
 0x797   :  { %v3415_v15 = vsel %vm624_vm9, %v1656_v13, %v3287_v50 }
 0x798   :  { %v3421_v24 = vsel %vm629_vm10, %v3415_v15, %v1648_v20  ;;  %v2193_v20 = vld [vmem:[%s3563_s26] ss:$0 sm:$0xff] }
 0x853   :  { %v1589_v14 = vpop.f32.mrb[16].mxu0 }
 0x854   :  { %v1590_v30 = vadd.f32 %v2180_v3, %v1589_v14  ;;  %v1591_v39 = vpop.f32.mrb[17].mxu0  ;;  %v1836_v14 = vld [vmem:[%s3560_s18 + $0x88] sm:$0xff] }
 0x855   :  { %v1837_v39 = vld [vmem:[%s3560_s18 + $0x90] sm:$0xff] }
 0x856   :  { %v1608_v8 = vmax.f32 %v1590_v30, 0.0 }
 0x858   :  { %v1619_v11 = vmul.f32 %v2185_v7, %v1608_v8  ;;  %v1594_v6 = vpop.f32.mrb[18].mxu0 }
 0x859   :  { %v1595_v5 = vadd.f32 %v2180_v3, %v1594_v6  ;;  %v1596_v12 = vpop.f32.mrb[19].mxu0 }
 0x85a   :  { %v1630_v16 = vadd.f32 %v2186_v10, %v1619_v11 }
 0x85b   :  { %v1609_v17 = vmax.f32 %v1595_v5, 0.0  ;;  %v2187_v5 = vld [vmem:[%s3561_s22] ss:$0 sm:$0xff] }
 0x85c   :  { %v1634_v19 = vadd.f32 %v1630_v16, %v3254_v18 }
 0x85d   :  { %v1620_v21 = vmul.f32 %v2185_v7, %v1609_v17  ;;  %v2192_v17 = vld [vmem:[%s3562_s23] ss:$0 sm:$0xff] }
 0x85e   :  { %v3417_v26 = vmax.f32 %v1634_v19, 0.0 }
 0x85f   :  { %v1631_v22 = vadd.f32 %v2186_v10, %v1620_v21 }
 0x860   :  { %1649 = vrot.lane.b32.xlu0 %v3417_v26, %s2606_s13  ;;  %2188 = vmatprep.mubr.msk.f32.mxu1 %vm385_vm7, %v3417_v26 }
 0x861   :  { %v3428_v18 = vadd.f32 %v1631_v22, %v3262_v23  ;;  %1763 = vmatmul.mubr.f32.vlgmr.msra.gmra.mrb[24].mxu1 %v3421_v24  ;;  %v2458_v23 = vpack.c.bf16 %v1822_v37, %v1821_v34 }
 0x862   :  { %v1599_v50 = vpop.f32.mrb[20].mxu0 }
 0x863   :  { %v1600_v27 = vadd.f32 %v2180_v3, %v1599_v50  ;;  %v1601_v32 = vpop.f32.mrb[21].mxu0  ;;  %v1639_v29 = vmax.f32 %v3428_v18, 0.0  ;;  %2459 = vmatpush1.bf16.msra.mxu0 %v2458_v23 }
 0x864   :  { %2460 = vmatprep.subr.bf16.mxu0 %v2604_v35 }
 0x865   :  { %v1610_v38 = vmax.f32 %v1600_v27, 0.0  ;;  %2189 = vmatprep.mubr.msk.f32.mxu1 %vm385_vm7, %v1639_v29 }
 0x867   :  { %v1621_v28 = vmul.f32 %v2185_v7, %v1610_v38  ;;  %v1604_v25 = vpop.f32.mrb[22].mxu0  ;;  %2462 = vmatpush1.bf16.msra.mxu0 %v2461_v49 }
 0x868   :  { %v1605_v44 = vadd.f32 %v2180_v3, %v1604_v25  ;;  %v1606_v45 = vpop.f32.mrb[23].mxu0  ;;  %2463 = vmatprep.subr.bf16.mxu0 %v2604_v35  ;;  %v1835_v3 = vld [vmem:[%s3560_s18 + $0x80] sm:$0xff] }
 0x869   :  { %v1632_v46 = vadd.f32 %v2186_v10, %v1621_v28  ;;  %v2479_v30 = vpack.c.bf16 %v1836_v14, %v1835_v3 }
 0x86a   :  { %v1611_v47 = vmax.f32 %v1605_v44, 0.0 }
 0x86b   :  { %v1636_v60 = vadd.f32 %v1632_v46, %v3272_v43  ;;  %v1827_v43 = vld [vmem:[%s3560_s18 + $0x40] sm:$0xff]  ;;  %2465 = vmatpush1.bf16.msra.mxu0 %v2464_v56  ;;  %v1978_v56 = vld [vmem:[%s2793_s6 + $0x18] sm:$0xff] }
 0x86c   :  { %v1622_v53 = vmul.f32 %v2185_v7, %v1611_v47  ;;  %v2467_v58 = vpack.c.bf16 %v1828_v57, %v1827_v43  ;;  %2466 = vmatprep.subr.bf16.mxu0 %v2604_v35  ;;  %v1838_v7 = vld [vmem:[%s3560_s18 + $0x98] sm:$0xff] }
 0x86d   :  { %v3446_v54 = vmax.f32 %v1636_v60, 0.0  ;;  %v2482_v8 = vpack.c.bf16 %v1838_v7, %v1837_v39 }
 0x86e   :  { %v1633_v55 = vadd.f32 %v2186_v10, %v1622_v53  ;;  %v2484_v53 = vpack.c.bf16 %v1976_v51, %v1975_v4 }
 0x86f   :  { %1651 = vrot.lane.b32.xlu1 %v3446_v54, %s2606_s13  ;;  %2468 = vmatpush1.bf16.msra.mxu0 %v2467_v58 }
 0x870   :  { %2469 = vmatprep.subr.bf16.mxu0 %v2604_v35  ;;  %v3470_v10 = vadd.f32 %v1633_v55, %v3278_v48  ;;  %2485 = vmatprep.subr.bf16.mxu1 %v2484_v53  ;;  %v1977_v55 = vld [vmem:[%s2793_s6 + $0x10] sm:$0xff]  ;;  %s2608_s6 = smov [#allocation2]  }
 0x871   :  { %2487 = vmatpush3.bf16.msra.mxu1 %v2484_v53  ;;  %v2488_v43 = vpack.c.bf16 %v1978_v56, %v1977_v55  ;;  %s2092_s12 = sshll.u32 %s2608_s6, 4  ;;  %s2093_s12 = int_to_ptr.vmem [resolvable:$true] %s2092_s12 }
 0x872   :  { %s2539_s2 = scalar_lea.vmem %s2093_s12, 512  ;;  %p2544_p1 = scmp.lt.s32.totalorder %s2093_s12, %s2093_s12 }
 0x873   :  { %2471 = vmatpush1.bf16.msra.mxu0 %v2470_v62  ;;  %2489 = vmatprep.subr.bf16.mxu1 %v2488_v43  ;;  %p2540_p0 = scmp.ne.s32.totalorder %s2093_s12, %s2539_s2  ;;  %p2545_p2 = scmp.lt.s32.totalorder %s2539_s2, %s2539_s2 }
 0x874   :  { %2472 = vmatprep.subr.bf16.mxu0 %v2604_v35 }
 0x875   :  { %2491 = vmatpush3.bf16.msra.mxu1 %v2488_v43  ;;  %p2546_p3 = por %p2545_p2, %p2544_p1 }
 0x877   :  { %2474 = vmatpush1.bf16.msra.mxu0 %v2473_v31  ;;  %p2547_p4 = pnand %p2546_p3, %p2540_p0 }
 0x878   :  { %2475 = vmatprep.subr.bf16.mxu0 %v2604_v35 }
 0x87b   :  { %2477 = vmatpush1.bf16.msra.mxu0 %v2476_v2 }
 0x87c   :  { %2478 = vmatprep.subr.bf16.mxu0 %v2604_v35 }
 0x87f   :  { %2480 = vmatpush1.bf16.msra.mxu0 %v2479_v30 }
 0x880   :  { %2481 = vmatprep.subr.bf16.mxu0 %v2604_v35  ;;  %v1641_v35 = vmax.f32 %v3470_v10, 0.0 }
 0x883   :  { %2483 = vmatpush1.bf16.msra.mxu0 %v2482_v8 }
 0x8d2   :  { %v1650_v9 = vpop.permute.xlu0 %1649 }
 0x8d3   :  { %v1659_v11 = vsel %vm629_vm10, %v3415_v15, %v1650_v9 }
 0x8d4   :  { %1768 = vmatmul.mubr.f32.gmra.mrb[26].mxu1 %v1659_v11 }
 0x8d5   :  { %2190 = vmatprep.mubr.msk.f32.mxu1 %vm385_vm7, %v3446_v54 }
 0x8d8   :  { %1773 = vmatmul.mubr.f32.gmra.mrb[28].mxu1 %v3421_v24 }
 0x8d9   :  { %2191 = vmatprep.mubr.msk.f32.mxu1 %vm385_vm7, %v1641_v35 }
 0x8e1   :  { %v1652_v6 = vpop.permute.xlu1 %1651 }
 0x8e2   :  { %v1660_v48 = vsel %vm629_vm10, %v3415_v15, %v1652_v6 }
 0x8e3   :  { %1778 = vmatmul.mubr.f32.gmra.mrb[30].mxu1 %v1660_v48 }
 0x934   :  { %v1764_v12 = vpop.f32.mrb[24].mxu1 }
 0x935   :  { %v1765_v13 = vadd.f32 %v2187_v5, %v1764_v12  ;;  %v1766_v16 = vpop.f32.mrb[25].mxu1 }
 0x937   :  { %v1783_v19 = vmax.f32 %v1765_v13, 0.0 }
 0x939   :  { %v1794_v21 = vmul.f32 %v2192_v17, %v1783_v19 }
 0x93b   :  { %v1805_v22 = vadd.f32 %v2193_v20, %v1794_v21 }
 0x93d   :  { %1811 = vrot.lane.b32.xlu0 %v1805_v22, %s2606_s13  ;;  %2195 = vmatprep.mubr.msk.f32.mxu0 %vm385_vm7, %v1805_v22 }
 0x93e   :  { %1921 = vmatmul.mubr.f32.vlgmr.msra.gmra.mrb[24].mxu0 %v3421_v24 }
 0x9a7   :  { %v1769_v50 = vpop.f32.mrb[26].mxu1 }
 0x9a8   :  { %v1770_v27 = vadd.f32 %v2187_v5, %v1769_v50  ;;  %v1771_v32 = vpop.f32.mrb[27].mxu1 }
 0x9a9   :  { %v2201_v32 = vld [vmem:[%s2798_s27] ss:$0 sm:$0xff] }
 0x9aa   :  { %v1784_v33 = vmax.f32 %v1770_v27, 0.0 }
 0x9ab   :  { %v1774_v40 = vpop.f32.mrb[28].mxu1 }
 0x9ac   :  { %v1795_v34 = vmul.f32 %v2192_v17, %v1784_v33  ;;  %v1775_v36 = vadd.f32 %v2187_v5, %v1774_v40  ;;  %v1776_v37 = vpop.f32.mrb[29].mxu1 }
 0x9ae   :  { %v1806_v38 = vadd.f32 %v2193_v20, %v1795_v34  ;;  %v1785_v23 = vmax.f32 %v1775_v36, 0.0 }
 0x9af   :  { %v1812_v28 = vpop.permute.xlu0 %1811 }
 0x9b0   :  { %v1796_v25 = vmul.f32 %v2192_v17, %v1785_v23  ;;  %2196 = vmatprep.mubr.msk.f32.mxu0 %vm385_vm7, %v1806_v38  ;;  %v1817_v41 = vsel %vm629_vm10, %v3415_v15, %v1812_v28 }
 0x9b1   :  { %1926 = vmatmul.mubr.f32.gmra.mrb[26].mxu0 %v1817_v41 }
 0x9b2   :  { %v1807_v42 = vadd.f32 %v2193_v20, %v1796_v25 }
 0x9b4   :  { %1813 = vrot.lane.b32.xlu1 %v1807_v42, %s2606_s13  ;;  %2197 = vmatprep.mubr.msk.f32.mxu0 %vm385_vm7, %v1807_v42 }
 0x9b5   :  { %1931 = vmatmul.mubr.f32.gmra.mrb[28].mxu0 %v3421_v24  ;;  %v2194_v24 = vld [vmem:[%s3564_s28] ss:$0 sm:$0xff] }
 0x9b6   :  { %v1779_v44 = vpop.f32.mrb[30].mxu1 }
 0x9b7   :  { %v1780_v45 = vadd.f32 %v2187_v5, %v1779_v44  ;;  %v1781_v46 = vpop.f32.mrb[31].mxu1 }
 0x9b9   :  { %v1786_v47 = vmax.f32 %v1780_v45, 0.0 }
 0x9bb   :  { %v1797_v49 = vmul.f32 %v2192_v17, %v1786_v47 }
 0x9bd   :  { %v1808_v60 = vadd.f32 %v2193_v20, %v1797_v49 }
 0x9bf   :  { %2198 = vmatprep.mubr.msk.f32.mxu0 %vm385_vm7, %v1808_v60 }
 0xa11   :  { %v1922_v57 = vpop.f32.mrb[24].mxu0 }
 0xa12   :  { %v1923_v58 = vadd.f32 %v2194_v24, %v1922_v57  ;;  %v1924_v59 = vpop.f32.mrb[25].mxu0 }
 0xa14   :  { %v1941_v62 = vmax.f32 %v1923_v58, 0.0 }
 0xa16   :  { %v1952_v63 = vmul.f32 %v2199_v61, %v1941_v62 }
 0xa18   :  { %v1963_v31 = vadd.f32 %v2200_v52, %v1952_v63 }
 0xa1a   :  { %v1967_v0 = vadd.f32 %v1963_v31, %v3417_v26 }
 0xa1c   :  { %v1971_v1 = vmax.f32 %v1967_v0, 0.0 }
 0xa1e   :  { %2260 = vmatprep.mubr.msk.f32.mxu1 %vm385_vm7, %v1971_v1 }
 0xa26   :  { %v1814_v2 = vpop.permute.xlu1 %1813 }
 0xa27   :  { %v1818_v3 = vsel %vm629_vm10, %v3415_v15, %v1814_v2 }
 0xa28   :  { %1936 = vmatmul.mubr.f32.gmra.mrb[30].mxu0 %v1818_v3 }
 0xa84   :  { %v1927_v14 = vpop.f32.mrb[26].mxu0 }
 0xa85   :  { %v1928_v30 = vadd.f32 %v2194_v24, %v1927_v14  ;;  %v1929_v39 = vpop.f32.mrb[27].mxu0 }
 0xa87   :  { %v1942_v7 = vmax.f32 %v1928_v30, 0.0 }
 0xa88   :  { %v1932_v8 = vpop.f32.mrb[28].mxu0 }
 0xa89   :  { %v1953_v9 = vmul.f32 %v2199_v61, %v1942_v7  ;;  %v1933_v11 = vadd.f32 %v2194_v24, %v1932_v8  ;;  %v1934_v6 = vpop.f32.mrb[29].mxu0 }
 0xa8b   :  { %v1964_v48 = vadd.f32 %v2200_v52, %v1953_v9  ;;  %v1943_v5 = vmax.f32 %v1933_v11, 0.0 }
 0xa8d   :  { %v1968_v26 = vadd.f32 %v1964_v48, %v1639_v29  ;;  %v1954_v12 = vmul.f32 %v2199_v61, %v1943_v5 }
 0xa8f   :  { %v1972_v13 = vmax.f32 %v1968_v26, 0.0  ;;  %v1965_v16 = vadd.f32 %v2200_v52, %v1954_v12 }
 0xa91   :  { %v1969_v15 = vadd.f32 %v1965_v16, %v3446_v54  ;;  %2261 = vmatmul.mubr.msk.f32.vlgmr.msra.gmra.mrb[32].mxu1 %vm385_vm7, %v1972_v13 }
 0xa93   :  { %v1973_v17 = vmax.f32 %v1969_v15, 0.0 }
 0xa95   :  { %2263 = vmatprep.mubr.msk.f32.mxu1 %vm385_vm7, %v1973_v17 }
 0xafb   :  { %v1937_v19 = vpop.f32.mrb[30].mxu0 }
 0xafc   :  { %v1938_v20 = vadd.f32 %v2194_v24, %v1937_v19  ;;  %v1939_v21 = vpop.f32.mrb[31].mxu0 }
 0xafe   :  { %v1944_v22 = vmax.f32 %v1938_v20, 0.0 }
 0xb00   :  { %v1955_v50 = vmul.f32 %v2199_v61, %v1944_v22 }
 0xb02   :  { %v1966_v27 = vadd.f32 %v2200_v52, %v1955_v50 }
 0xb04   :  { %v1970_v18 = vadd.f32 %v1966_v27, %v1641_v35 }
 0xb06   :  { %v1974_v29 = vmax.f32 %v1970_v18, 0.0 }
 0xb08   :  { %2264 = vmatmul.mubr.msk.f32.gmra.mrb[34].mxu1 %vm385_vm7, %v1974_v29 }
 0xb64   :  { %v2262_v33 = vpop.f32.mrb[32].mxu1 }
 0xb65   :  { %v2070_v54 = vadd.f32 %v2262_v33, %v2201_v32  ;;  %v2064_v40 = vpop.f32.mrb[33].mxu1 }
 0xb66   :  { %v2065_v34 = vadd.f32 %v2201_v32, %v2064_v40 }
 0xb67   :  { %2084 = vst [vmem:[#allocation2 + $0x8] sm:$0xff] %v2070_v54 }
 0xb68   :  { %2083 = vst [vmem:[#allocation2] sm:$0xff] %v2065_v34 }
 0xbdb   :  { %v2265_v36 = vpop.f32.mrb[34].mxu1 }
 0xbdc   :  { %v2080_v37 = vadd.f32 %v2265_v36, %v2201_v32  ;;  %v2074_v38 = vpop.f32.mrb[35].mxu1 }
 0xbdd   :  { %v2075_v23 = vadd.f32 %v2201_v32, %v2074_v38 }
 0xbde   :  { %2086 = vst [vmem:[#allocation2 + $0x18] sm:$0xff] %v2080_v37 }
 0xbdf   :  { %2085 = vst [vmem:[#allocation2 + $0x10] sm:$0xff] %v2075_v23 }
 0xbe0   :  { %2550 = shalt.err (!%p2547_p4)
}
 0xbe1   :  { %s2551_s27 = scalar_lea.hbm %s2803_s4, 512 }
 0xbe2   :  { %p2552_p5 = scmp.ne.s32.totalorder %s2803_s4, %s2551_s27  ;;  %p2555_p6 = scmp.lt.u32.totalorder %s2551_s27, %s2803_s4 }
 0xbe4   :  { %p2557_p7 = pnand %p2555_p6, %p2552_p5 }
 0xbe6   :  { %2560 = shalt.err (!%p2557_p7)
}
 0xbe7   :  { %s2609_s0 = smov 128  }
 0xbe8   :  { %2098 = dma.vmem_to_hbm [thread:$0]  %s2093_s12, 512, %s2803_s4, [#allocation3], %s2609_s0, %s2609_s0, %s2601_s14  }
 0xbe9   :  { %2561 = dma.done.wait [#allocation3], 512  }
 0xbea   :  { %2562 = vsyncadd [#allocation3], 4294966784 }
 0xbeb   :  { %2102 = vsyncpa [#allocation3], 1 }

</bundles_post_ra>
